<compile_context>
chip_gen: v5e
topology: v5e:2x2
jax: 0.10.0
libtpu: 0.0.40
codegen_flags: <defaults>
</compile_context>

<pallas_src>
import math
import jax
import jax.numpy as jnp
import numpy as np
from jax.experimental import pallas as pl
from jax.experimental.pallas import tpu as pltpu

# ---------------- small-BERT config (synthetic; not the 12-layer 768-d HF model) ----
B, S = 2, 8           # batch, sequence length
H = 32                # hidden size
NH = 2                # attention heads
DH = H // NH          # head dim
FF = 64               # intermediate (FFN) size
L = 2                 # number of encoder layers
VOCAB = 100
MAX_POS = 16
EPS = 1e-12           # BERT LayerNorm eps

# TODO(synk): when scaling to real BERT dims (H=768, S=512, FF=3072) do not keep the
# full activation + all stacked weights VMEM-resident; tile S and stream weights over
# an L grid axis and set vmem_limit_bytes (v7x has only 64 MiB VMEM).


# ------------------------------- in-kernel math helpers ----------------------------
def _layernorm(x, gamma, beta):
    # var = E[x^2] - mu^2: one pass over x for both moments; 1/N is a compile-time const.
    inv_n = 1.0 / x.shape[-1]
    mu = jnp.sum(x, axis=-1, keepdims=True) * inv_n
    ex2 = jnp.sum(x * x, axis=-1, keepdims=True) * inv_n
    var = jnp.maximum(ex2 - mu * mu, 0.0)
    return (x - mu) * jax.lax.rsqrt(var + EPS) * gamma + beta


def _gelu(x):
    # TODO(synk): HF BERT uses exact erf-based GELU; tanh approximation used here.
    c = math.sqrt(2.0 / math.pi)
    return 0.5 * x * (1.0 + jnp.tanh(c * (x + 0.044715 * x * x * x)))


# ------------------------------------ fused kernel ----------------------------------
def fused_encoder_kernel(word_ref, bias_ref, postype_ref, eg_ref, eb_ref,
                         wqkv_ref, bqkv_ref, wo_ref, bo_ref,
                         g1_ref, be1_ref, w1_ref, b1_ref,
                         w2_ref, b2_ref, g2_ref, be2_ref,
                         out_ref):
    # One grid step == one sequence of the batch.
    x = word_ref[0].astype(jnp.float32) + postype_ref[...]            # (S, H)
    x = _layernorm(x, eg_ref[...], eb_ref[...])
    bias = bias_ref[0]                                                # (1, S) over keys
    scale = 1.0 / math.sqrt(DH)

    for l in range(L):                       # static unroll; all weights stay in VMEM
        # ---- attention: Q/K/V for all heads in a single batched einsum ----
        xb = jnp.broadcast_to(x, (3 * NH, S, H))                      # heads/QKV on batch axis
        qkvh = jnp.einsum('nsd,ndh->nsh', xb, wqkv_ref[l],
                          preferred_element_type=jnp.float32) + bqkv_ref[l]   # (3NH,S,DH)
        q = qkvh[0:NH]
        k = qkvh[NH:2 * NH]
        v = qkvh[2 * NH:]

        s = jnp.einsum('nqd,nkd->nqk', q, k,
                       preferred_element_type=jnp.float32) * scale + bias     # (NH,S,S)
        m = jnp.max(s, axis=-1, keepdims=True)
        e = jnp.exp(s - m)
        p = e * pl.reciprocal(jnp.sum(e, axis=-1, keepdims=True), approx=True)
        ctx = jnp.einsum('nqk,nkd->nqd', p, v,
                         preferred_element_type=jnp.float32)                  # (NH,S,DH)

        # output projection as head-batched matmul, summed over heads (no lane concat)
        attn_h = jnp.einsum('nsd,ndh->nsh', ctx, wo_ref[l],
                            preferred_element_type=jnp.float32)               # (NH,S,H)
        attn = attn_h[0]
        for n in range(1, NH):
            attn = attn + attn_h[n]
        attn = attn + bo_ref[l]

        x1 = _layernorm(x + attn, g1_ref[l], be1_ref[l])

        # ---- FFN ----
        hdn = _gelu(jnp.dot(x1, w1_ref[l],
                            preferred_element_type=jnp.float32) + b1_ref[l])  # (S,FF)
        ff = jnp.dot(hdn, w2_ref[l],
                     preferred_element_type=jnp.float32) + b2_ref[l]          # (S,H)
        x = _layernorm(x1 + ff, g2_ref[l], be2_ref[l])

    # Only the CLS row is consumed downstream -> write just that row back.
    out_ref[...] = x[0:1, :].reshape(1, 1, H).astype(out_ref.dtype)


# ----------------------------------- wrappers ---------------------------------------
def pack_params(params):
    """Repack PyTorch-style per-layer weights into stacked, head-split kernel layout."""
    def split_cols(w):   # (H, NH*DH) -> (NH, H, DH)
        return jnp.stack([w[:, n * DH:(n + 1) * DH] for n in range(NH)], axis=0)

    def split_cols_b(b_):  # (1, NH*DH) -> (NH, 1, DH)
        return jnp.stack([b_[:, n * DH:(n + 1) * DH] for n in range(NH)], axis=0)

    def split_rows(w):   # (NH*DH, H) -> (NH, DH, H)
        return jnp.stack([w[n * DH:(n + 1) * DH, :] for n in range(NH)], axis=0)

    wqkv, bqkv, wo, bo, g1, be1, w1, b1, w2, b2, g2, be2 = ([] for _ in range(12))
    for (wq, bq, wk, bk, wv, bv, wo_, bo_, g1_, be1_,
         w1_, b1_, w2_, b2_, g2_, be2_) in params['layers']:
        wqkv.append(jnp.concatenate([split_cols(wq), split_cols(wk), split_cols(wv)], 0))
        bqkv.append(jnp.concatenate([split_cols_b(bq), split_cols_b(bk), split_cols_b(bv)], 0))
        wo.append(split_rows(wo_)); bo.append(bo_)
        g1.append(g1_); be1.append(be1_)
        w1.append(w1_); b1.append(b1_)
        w2.append(w2_); b2.append(b2_)
        g2.append(g2_); be2.append(be2_)

    st = lambda xs: jnp.stack(xs, axis=0)
    return (st(wqkv), st(bqkv), st(wo), st(bo), st(g1), st(be1),
            st(w1), st(b1), st(w2), st(b2), st(g2), st(be2))


def _full_spec(shape):
    nd = len(shape)
    return pl.BlockSpec(shape, lambda b, _nd=nd: (0,) * _nd)


def encoder_forward(params, input_ids, attention_mask):
    # embedding gather (plain-JAX glue) + summed position/type embedding
    word_emb = params['word'][input_ids]                                  # (B,S,H)
    postype = params['pos'][:S] + params['type'][0][None, :]              # (S,H)
    # additive attention-mask bias precomputed once (hoisted out of the layer loop)
    bias = ((1.0 - attention_mask.astype(jnp.float32)) * -10000.0)[:, None, :]   # (B,1,S)

    packed = pack_params(params)
    args = (word_emb, bias, postype, params['emb_gamma'], params['emb_beta']) + packed

    in_specs = [
        pl.BlockSpec((1, S, H), lambda b: (b, 0, 0)),   # word embeddings, per sequence
        pl.BlockSpec((1, 1, S), lambda b: (b, 0, 0)),   # mask bias, per sequence
    ] + [_full_spec(a.shape) for a in args[2:]]         # shared embeddings + stacked weights
    out_specs = pl.BlockSpec((1, 1, H), lambda b: (b, 0, 0))

    cls = pl.pallas_call(
        fused_encoder_kernel,
        out_shape=jax.ShapeDtypeStruct((B, 1, H), jnp.float32),
        grid_spec=pltpu.PrefetchScalarGridSpec(
            num_scalar_prefetch=0,
            grid=(B,),
            in_specs=in_specs,
            out_specs=out_specs),
        compiler_params=pltpu.CompilerParams(
            dimension_semantics=("parallel",)),          # batch split across TCs on v7x
    )(*args)
    return cls[:, 0, :]                                  # (B, H) CLS embeddings


# ------------------------------- pure-JAX reference ----------------------------------
def reference_forward(params, input_ids, attention_mask):
    word_emb = params['word'][input_ids]
    postype = params['pos'][:S] + params['type'][0][None, :]
    x = _layernorm(word_emb + postype[None], params['emb_gamma'], params['emb_beta'])
    mask = attention_mask.astype(jnp.float32)
    bias = (1.0 - mask)[:, None, None, :] * -10000.0
    for (wq, bq, wk, bk, wv, bv, wo, bo, g1, be1, w1, b1, w2, b2, g2, be2) in params['layers']:
        q = (x @ wq + bq).reshape(B, S, NH, DH)
        k = (x @ wk + bk).reshape(B, S, NH, DH)
        v = (x @ wv + bv).reshape(B, S, NH, DH)
        s = jnp.einsum('bqnd,bknd->bnqk', q, k) / math.sqrt(DH) + bias
        p = jax.nn.softmax(s, axis=-1)
        ctx = jnp.einsum('bnqk,bknd->bqnd', p, v).reshape(B, S, H)
        x1 = _layernorm(x + ctx @ wo + bo, g1, be1)
        ff = _gelu(x1 @ w1 + b1) @ w2 + b2
        x = _layernorm(x1 + ff, g2, be2)
    return x[:, 0, :]


# ------------------------------- deterministic params --------------------------------
def init_params(key):
    # synthetic deterministic init (module normally loads pretrained mBERT weights)
    keys = iter(jax.random.split(key, 8 + L * 16))
    std = 0.02

    def w(shape):
        return jax.random.normal(next(keys), shape, jnp.float32) * std

    params = {
        'word': w((VOCAB, H)),
        'pos': w((MAX_POS, H)),
        'type': w((2, H)),
        'emb_gamma': jnp.ones((1, H), jnp.float32),
        'emb_beta': jnp.zeros((1, H), jnp.float32),
        'layers': [],
    }
    for _ in range(L):
        layer = (
            w((H, H)), w((1, H)),        # Wq, bq
            w((H, H)), w((1, H)),        # Wk, bk
            w((H, H)), w((1, H)),        # Wv, bv
            w((H, H)), w((1, H)),        # Wo, bo
            jnp.ones((1, H), jnp.float32), jnp.zeros((1, H), jnp.float32),  # LN1
            w((H, FF)), w((1, FF)),      # FFN in
            w((FF, H)), w((1, H)),       # FFN out
            jnp.ones((1, H), jnp.float32), jnp.zeros((1, H), jnp.float32),  # LN2
        )
        params['layers'].append(layer)
    return params


# --------------------------------------- main ----------------------------------------
if __name__ == "__main__":
    root = jax.random.PRNGKey(0)
    pkey, ikey = jax.random.split(root)
    params = init_params(pkey)

    input_ids = jax.random.randint(ikey, (B, S), 0, VOCAB, dtype=jnp.int32)
    attention_mask = jnp.array([[1] * S, [1] * (S - 2) + [0] * 2], dtype=jnp.int32)

    cls_emb = encoder_forward(params, input_ids, attention_mask)
    cls_emb = jax.block_until_ready(cls_emb)

    ref = reference_forward(params, input_ids, attention_mask)

    assert cls_emb.shape == (B, H), cls_emb.shape
    assert bool(jnp.all(jnp.isfinite(cls_emb)))
    if not np.allclose(np.asarray(cls_emb), np.asarray(ref), atol=2e-2, rtol=2e-2):
        raise AssertionError("Pallas output mismatches pure-JAX reference")
    print("KERNEL_OK")
</pallas_src>

<mosaic_0001>
module attributes {stable_mosaic.version = 11 : i64} {
  func.func @fused_encoder_kernel(%arg0: i32, %arg1: memref<1x8x32xf32, #tpu.memory_space<vmem>>, %arg2: memref<1x1x8xf32, #tpu.memory_space<vmem>>, %arg3: memref<8x32xf32, #tpu.memory_space<vmem>>, %arg4: memref<1x32xf32, #tpu.memory_space<vmem>>, %arg5: memref<1x32xf32, #tpu.memory_space<vmem>>, %arg6: memref<2x6x32x16xf32, #tpu.memory_space<vmem>>, %arg7: memref<2x6x1x16xf32, #tpu.memory_space<vmem>>, %arg8: memref<2x2x16x32xf32, #tpu.memory_space<vmem>>, %arg9: memref<2x1x32xf32, #tpu.memory_space<vmem>>, %arg10: memref<2x1x32xf32, #tpu.memory_space<vmem>>, %arg11: memref<2x1x32xf32, #tpu.memory_space<vmem>>, %arg12: memref<2x32x64xf32, #tpu.memory_space<vmem>>, %arg13: memref<2x1x64xf32, #tpu.memory_space<vmem>>, %arg14: memref<2x64x32xf32, #tpu.memory_space<vmem>>, %arg15: memref<2x1x32xf32, #tpu.memory_space<vmem>>, %arg16: memref<2x1x32xf32, #tpu.memory_space<vmem>>, %arg17: memref<2x1x32xf32, #tpu.memory_space<vmem>>, %arg18: memref<1x1x32xf32, #tpu.memory_space<vmem>>) attributes {dimension_semantics = [#tpu.dimension_semantics<parallel>], iteration_bounds = array<i64: 2>, scalar_prefetch = 0 : i64, scratch_operands = 0 : i64, tpu.core_type = #tpu.core_type<tc>, window_params = [{transform_indices = @transform_0, window_bounds = array<i64: 1, 8, 32>}, {transform_indices = @transform_1, window_bounds = array<i64: 1, 1, 8>}, {pipeline_mode = #tpu.pipeline_mode<synchronous>, transform_indices = @transform_2, window_bounds = array<i64: 8, 32>}, {pipeline_mode = #tpu.pipeline_mode<synchronous>, transform_indices = @transform_3, window_bounds = array<i64: 1, 32>}, {pipeline_mode = #tpu.pipeline_mode<synchronous>, transform_indices = @transform_4, window_bounds = array<i64: 1, 32>}, {pipeline_mode = #tpu.pipeline_mode<synchronous>, transform_indices = @transform_5, window_bounds = array<i64: 2, 6, 32, 16>}, {pipeline_mode = #tpu.pipeline_mode<synchronous>, transform_indices = @transform_6, window_bounds = array<i64: 2, 6, 1, 16>}, {pipeline_mode = #tpu.pipeline_mode<synchronous>, transform_indices = @transform_7, window_bounds = array<i64: 2, 2, 16, 32>}, {pipeline_mode = #tpu.pipeline_mode<synchronous>, transform_indices = @transform_8, window_bounds = array<i64: 2, 1, 32>}, {pipeline_mode = #tpu.pipeline_mode<synchronous>, transform_indices = @transform_9, window_bounds = array<i64: 2, 1, 32>}, {pipeline_mode = #tpu.pipeline_mode<synchronous>, transform_indices = @transform_10, window_bounds = array<i64: 2, 1, 32>}, {pipeline_mode = #tpu.pipeline_mode<synchronous>, transform_indices = @transform_11, window_bounds = array<i64: 2, 32, 64>}, {pipeline_mode = #tpu.pipeline_mode<synchronous>, transform_indices = @transform_12, window_bounds = array<i64: 2, 1, 64>}, {pipeline_mode = #tpu.pipeline_mode<synchronous>, transform_indices = @transform_13, window_bounds = array<i64: 2, 64, 32>}, {pipeline_mode = #tpu.pipeline_mode<synchronous>, transform_indices = @transform_14, window_bounds = array<i64: 2, 1, 32>}, {pipeline_mode = #tpu.pipeline_mode<synchronous>, transform_indices = @transform_15, window_bounds = array<i64: 2, 1, 32>}, {pipeline_mode = #tpu.pipeline_mode<synchronous>, transform_indices = @transform_16, window_bounds = array<i64: 2, 1, 32>}, {transform_indices = @transform_17, window_bounds = array<i64: 1, 1, 32>}]} {
    %c0 = arith.constant 0 : index
    %c0_0 = arith.constant 0 : index
    %c0_1 = arith.constant 0 : index
    %0 = vector.load %arg1[%c0, %c0_0, %c0_1] : memref<1x8x32xf32, #tpu.memory_space<vmem>>, vector<1x8x32xf32>
    %1 = vector.shape_cast %0 : vector<1x8x32xf32> to vector<8x32xf32>
    %c0_2 = arith.constant 0 : index
    %c0_3 = arith.constant 0 : index
    %2 = vector.load %arg3[%c0_2, %c0_3] : memref<8x32xf32, #tpu.memory_space<vmem>>, vector<8x32xf32>
    %3 = arith.addf %1, %2 : vector<8x32xf32>
    %c0_4 = arith.constant 0 : index
    %c0_5 = arith.constant 0 : index
    %4 = vector.load %arg4[%c0_4, %c0_5] : memref<1x32xf32, #tpu.memory_space<vmem>>, vector<1x32xf32>
    %c0_6 = arith.constant 0 : index
    %c0_7 = arith.constant 0 : index
    %5 = vector.load %arg5[%c0_6, %c0_7] : memref<1x32xf32, #tpu.memory_space<vmem>>, vector<1x32xf32>
    %cst = arith.constant dense<0.000000e+00> : vector<8xf32>
    %6 = vector.multi_reduction <add>, %3, %cst [1] : vector<8x32xf32> to vector<8xf32>
    %7 = vector.shape_cast %6 : vector<8xf32> to vector<8x1xf32>
    %cst_8 = arith.constant 3.125000e-02 : f32
    %8 = vector.broadcast %cst_8 : f32 to vector<8x1xf32>
    %9 = arith.mulf %7, %8 : vector<8x1xf32>
    %10 = arith.mulf %3, %3 : vector<8x32xf32>
    %cst_9 = arith.constant dense<0.000000e+00> : vector<8xf32>
    %11 = vector.multi_reduction <add>, %10, %cst_9 [1] : vector<8x32xf32> to vector<8xf32>
    %12 = vector.shape_cast %11 : vector<8xf32> to vector<8x1xf32>
    %cst_10 = arith.constant 3.125000e-02 : f32
    %13 = vector.broadcast %cst_10 : f32 to vector<8x1xf32>
    %14 = arith.mulf %12, %13 : vector<8x1xf32>
    %15 = arith.mulf %9, %9 : vector<8x1xf32>
    %16 = arith.subf %14, %15 : vector<8x1xf32>
    %cst_11 = arith.constant 0.000000e+00 : f32
    %17 = vector.broadcast %cst_11 : f32 to vector<8x1xf32>
    %18 = arith.maximumf %16, %17 : vector<8x1xf32>
    %19 = vector.broadcast %9 : vector<8x1xf32> to vector<8x32xf32>
    %20 = arith.subf %3, %19 : vector<8x32xf32>
    %cst_12 = arith.constant 9.99999996E-13 : f32
    %21 = vector.broadcast %cst_12 : f32 to vector<8x1xf32>
    %22 = arith.addf %18, %21 : vector<8x1xf32>
    %23 = math.rsqrt %22 : vector<8x1xf32>
    %24 = vector.broadcast %23 : vector<8x1xf32> to vector<8x32xf32>
    %25 = arith.mulf %20, %24 : vector<8x32xf32>
    %26 = vector.broadcast %4 : vector<1x32xf32> to vector<8x32xf32>
    %27 = arith.mulf %25, %26 : vector<8x32xf32>
    %28 = vector.broadcast %5 : vector<1x32xf32> to vector<8x32xf32>
    %29 = arith.addf %27, %28 : vector<8x32xf32>
    %c0_13 = arith.constant 0 : index
    %c0_14 = arith.constant 0 : index
    %c0_15 = arith.constant 0 : index
    %30 = vector.load %arg2[%c0_13, %c0_14, %c0_15] : memref<1x1x8xf32, #tpu.memory_space<vmem>>, vector<1x1x8xf32>
    %31 = vector.shape_cast %30 : vector<1x1x8xf32> to vector<1x8xf32>
    %32 = vector.shape_cast %29 : vector<8x32xf32> to vector<1x8x32xf32>
    %33 = vector.broadcast %32 : vector<1x8x32xf32> to vector<6x8x32xf32>
    %c0_16 = arith.constant 0 : index
    %c0_17 = arith.constant 0 : index
    %c0_18 = arith.constant 0 : index
    %c0_19 = arith.constant 0 : index
    %34 = vector.load %arg6[%c0_16, %c0_17, %c0_18, %c0_19] : memref<2x6x32x16xf32, #tpu.memory_space<vmem>>, vector<1x6x32x16xf32>
    %35 = vector.shape_cast %34 : vector<1x6x32x16xf32> to vector<6x32x16xf32>
    "tpu.trace_start"() <{level = 10 : i32, message = "nsd,ndh->nsh"}> : () -> ()
    %cst_20 = arith.constant dense<0.000000e+00> : vector<6x8x16xf32>
    %36 = tpu.matmul %33, %35, %cst_20 {dimension_numbers = #tpu.dot_dimension_numbers<[2], [1], [1], [2], [0, 0, 0, 1, 1, 2], [0], [0]>} : vector<6x8x32xf32>, vector<6x32x16xf32>, vector<6x8x16xf32> -> vector<6x8x16xf32>
    "tpu.trace_stop"() : () -> ()
    %c0_21 = arith.constant 0 : index
    %c0_22 = arith.constant 0 : index
    %c0_23 = arith.constant 0 : index
    %c0_24 = arith.constant 0 : index
    %37 = vector.load %arg7[%c0_21, %c0_22, %c0_23, %c0_24] : memref<2x6x1x16xf32, #tpu.memory_space<vmem>>, vector<1x6x1x16xf32>
    %38 = vector.shape_cast %37 : vector<1x6x1x16xf32> to vector<6x1x16xf32>
    %39 = vector.broadcast %38 : vector<6x1x16xf32> to vector<6x8x16xf32>
    %40 = arith.addf %36, %39 : vector<6x8x16xf32>
    %41 = vector.extract_strided_slice %40 {offsets = [0, 0, 0], sizes = [2, 8, 16], strides = [1, 1, 1]} : vector<6x8x16xf32> to vector<2x8x16xf32>
    %42 = vector.extract_strided_slice %40 {offsets = [2, 0, 0], sizes = [2, 8, 16], strides = [1, 1, 1]} : vector<6x8x16xf32> to vector<2x8x16xf32>
    %43 = vector.extract_strided_slice %40 {offsets = [4, 0, 0], sizes = [2, 8, 16], strides = [1, 1, 1]} : vector<6x8x16xf32> to vector<2x8x16xf32>
    "tpu.trace_start"() <{level = 10 : i32, message = "nqd,nkd->nqk"}> : () -> ()
    %cst_25 = arith.constant dense<0.000000e+00> : vector<2x8x8xf32>
    %44 = tpu.matmul %41, %42, %cst_25 {dimension_numbers = #tpu.dot_dimension_numbers<[2], [2], [1], [1], [0, 0, 0, 1, 1, 1], [0], [0]>} : vector<2x8x16xf32>, vector<2x8x16xf32>, vector<2x8x8xf32> -> vector<2x8x8xf32>
    "tpu.trace_stop"() : () -> ()
    %cst_26 = arith.constant 2.500000e-01 : f32
    %45 = vector.broadcast %cst_26 : f32 to vector<2x8x8xf32>
    %46 = arith.mulf %44, %45 : vector<2x8x8xf32>
    %47 = vector.shape_cast %31 : vector<1x8xf32> to vector<1x1x8xf32>
    %48 = vector.broadcast %47 : vector<1x1x8xf32> to vector<2x8x8xf32>
    %49 = arith.addf %46, %48 : vector<2x8x8xf32>
    %cst_27 = arith.constant dense<0xFF800000> : vector<2x8xf32>
    %50 = vector.multi_reduction <maximumf>, %49, %cst_27 [2] : vector<2x8x8xf32> to vector<2x8xf32>
    %51 = vector.shape_cast %50 : vector<2x8xf32> to vector<2x8x1xf32>
    %52 = vector.broadcast %51 : vector<2x8x1xf32> to vector<2x8x8xf32>
    %53 = arith.subf %49, %52 : vector<2x8x8xf32>
    %54 = math.exp %53 : vector<2x8x8xf32>
    %cst_28 = arith.constant dense<0.000000e+00> : vector<2x8xf32>
    %55 = vector.multi_reduction <add>, %54, %cst_28 [2] : vector<2x8x8xf32> to vector<2x8xf32>
    %56 = vector.shape_cast %55 : vector<2x8xf32> to vector<2x8x1xf32>
    %57 = tpu.reciprocal %56 {approx = true} : vector<2x8x1xf32> -> vector<2x8x1xf32>
    %58 = vector.broadcast %57 : vector<2x8x1xf32> to vector<2x8x8xf32>
    %59 = arith.mulf %54, %58 : vector<2x8x8xf32>
    "tpu.trace_start"() <{level = 10 : i32, message = "nqk,nkd->nqd"}> : () -> ()
    %cst_29 = arith.constant dense<0.000000e+00> : vector<2x8x16xf32>
    %60 = tpu.matmul %59, %43, %cst_29 {dimension_numbers = #tpu.dot_dimension_numbers<[2], [1], [1], [2], [0, 0, 0, 1, 1, 2], [0], [0]>} : vector<2x8x8xf32>, vector<2x8x16xf32>, vector<2x8x16xf32> -> vector<2x8x16xf32>
    "tpu.trace_stop"() : () -> ()
    %c0_30 = arith.constant 0 : index
    %c0_31 = arith.constant 0 : index
    %c0_32 = arith.constant 0 : index
    %c0_33 = arith.constant 0 : index
    %61 = vector.load %arg8[%c0_30, %c0_31, %c0_32, %c0_33] : memref<2x2x16x32xf32, #tpu.memory_space<vmem>>, vector<1x2x16x32xf32>
    %62 = vector.shape_cast %61 : vector<1x2x16x32xf32> to vector<2x16x32xf32>
    "tpu.trace_start"() <{level = 10 : i32, message = "nsd,ndh->nsh"}> : () -> ()
    %cst_34 = arith.constant dense<0.000000e+00> : vector<2x8x32xf32>
    %63 = tpu.matmul %60, %62, %cst_34 {dimension_numbers = #tpu.dot_dimension_numbers<[2], [1], [1], [2], [0, 0, 0, 1, 1, 2], [0], [0]>} : vector<2x8x16xf32>, vector<2x16x32xf32>, vector<2x8x32xf32> -> vector<2x8x32xf32>
    "tpu.trace_stop"() : () -> ()
    %64 = vector.extract_strided_slice %63 {offsets = [0, 0, 0], sizes = [1, 8, 32], strides = [1, 1, 1]} : vector<2x8x32xf32> to vector<1x8x32xf32>
    %65 = vector.shape_cast %64 : vector<1x8x32xf32> to vector<8x32xf32>
    %66 = vector.extract_strided_slice %63 {offsets = [1, 0, 0], sizes = [1, 8, 32], strides = [1, 1, 1]} : vector<2x8x32xf32> to vector<1x8x32xf32>
    %67 = vector.shape_cast %66 : vector<1x8x32xf32> to vector<8x32xf32>
    %68 = arith.addf %65, %67 : vector<8x32xf32>
    %c0_35 = arith.constant 0 : index
    %c0_36 = arith.constant 0 : index
    %c0_37 = arith.constant 0 : index
    %69 = vector.load %arg9[%c0_35, %c0_36, %c0_37] : memref<2x1x32xf32, #tpu.memory_space<vmem>>, vector<1x1x32xf32>
    %70 = vector.shape_cast %69 : vector<1x1x32xf32> to vector<1x32xf32>
    %71 = vector.broadcast %70 : vector<1x32xf32> to vector<8x32xf32>
    %72 = arith.addf %68, %71 : vector<8x32xf32>
    %73 = arith.addf %29, %72 : vector<8x32xf32>
    %c0_38 = arith.constant 0 : index
    %c0_39 = arith.constant 0 : index
    %c0_40 = arith.constant 0 : index
    %74 = vector.load %arg10[%c0_38, %c0_39, %c0_40] : memref<2x1x32xf32, #tpu.memory_space<vmem>>, vector<1x1x32xf32>
    %75 = vector.shape_cast %74 : vector<1x1x32xf32> to vector<1x32xf32>
    %c0_41 = arith.constant 0 : index
    %c0_42 = arith.constant 0 : index
    %c0_43 = arith.constant 0 : index
    %76 = vector.load %arg11[%c0_41, %c0_42, %c0_43] : memref<2x1x32xf32, #tpu.memory_space<vmem>>, vector<1x1x32xf32>
    %77 = vector.shape_cast %76 : vector<1x1x32xf32> to vector<1x32xf32>
    %cst_44 = arith.constant dense<0.000000e+00> : vector<8xf32>
    %78 = vector.multi_reduction <add>, %73, %cst_44 [1] : vector<8x32xf32> to vector<8xf32>
    %79 = vector.shape_cast %78 : vector<8xf32> to vector<8x1xf32>
    %cst_45 = arith.constant 3.125000e-02 : f32
    %80 = vector.broadcast %cst_45 : f32 to vector<8x1xf32>
    %81 = arith.mulf %79, %80 : vector<8x1xf32>
    %82 = arith.mulf %73, %73 : vector<8x32xf32>
    %cst_46 = arith.constant dense<0.000000e+00> : vector<8xf32>
    %83 = vector.multi_reduction <add>, %82, %cst_46 [1] : vector<8x32xf32> to vector<8xf32>
    %84 = vector.shape_cast %83 : vector<8xf32> to vector<8x1xf32>
    %cst_47 = arith.constant 3.125000e-02 : f32
    %85 = vector.broadcast %cst_47 : f32 to vector<8x1xf32>
    %86 = arith.mulf %84, %85 : vector<8x1xf32>
    %87 = arith.mulf %81, %81 : vector<8x1xf32>
    %88 = arith.subf %86, %87 : vector<8x1xf32>
    %cst_48 = arith.constant 0.000000e+00 : f32
    %89 = vector.broadcast %cst_48 : f32 to vector<8x1xf32>
    %90 = arith.maximumf %88, %89 : vector<8x1xf32>
    %91 = vector.broadcast %81 : vector<8x1xf32> to vector<8x32xf32>
    %92 = arith.subf %73, %91 : vector<8x32xf32>
    %cst_49 = arith.constant 9.99999996E-13 : f32
    %93 = vector.broadcast %cst_49 : f32 to vector<8x1xf32>
    %94 = arith.addf %90, %93 : vector<8x1xf32>
    %95 = math.rsqrt %94 : vector<8x1xf32>
    %96 = vector.broadcast %95 : vector<8x1xf32> to vector<8x32xf32>
    %97 = arith.mulf %92, %96 : vector<8x32xf32>
    %98 = vector.broadcast %75 : vector<1x32xf32> to vector<8x32xf32>
    %99 = arith.mulf %97, %98 : vector<8x32xf32>
    %100 = vector.broadcast %77 : vector<1x32xf32> to vector<8x32xf32>
    %101 = arith.addf %99, %100 : vector<8x32xf32>
    %c0_50 = arith.constant 0 : index
    %c0_51 = arith.constant 0 : index
    %c0_52 = arith.constant 0 : index
    %102 = vector.load %arg12[%c0_50, %c0_51, %c0_52] : memref<2x32x64xf32, #tpu.memory_space<vmem>>, vector<1x32x64xf32>
    %103 = vector.shape_cast %102 : vector<1x32x64xf32> to vector<32x64xf32>
    %cst_53 = arith.constant dense<0.000000e+00> : vector<8x64xf32>
    %104 = tpu.matmul %101, %103, %cst_53 {dimension_numbers = #tpu.dot_dimension_numbers<[1], [0], [0], [1], [0, 0, 1, 1], [], []>} : vector<8x32xf32>, vector<32x64xf32>, vector<8x64xf32> -> vector<8x64xf32>
    %c0_54 = arith.constant 0 : index
    %c0_55 = arith.constant 0 : index
    %c0_56 = arith.constant 0 : index
    %105 = vector.load %arg13[%c0_54, %c0_55, %c0_56] : memref<2x1x64xf32, #tpu.memory_space<vmem>>, vector<1x1x64xf32>
    %106 = vector.shape_cast %105 : vector<1x1x64xf32> to vector<1x64xf32>
    %107 = vector.broadcast %106 : vector<1x64xf32> to vector<8x64xf32>
    %108 = arith.addf %104, %107 : vector<8x64xf32>
    %cst_57 = arith.constant 5.000000e-01 : f32
    %109 = vector.broadcast %cst_57 : f32 to vector<8x64xf32>
    %110 = arith.mulf %109, %108 : vector<8x64xf32>
    %cst_58 = arith.constant 4.471500e-02 : f32
    %111 = vector.broadcast %cst_58 : f32 to vector<8x64xf32>
    %112 = arith.mulf %111, %108 : vector<8x64xf32>
    %113 = arith.mulf %112, %108 : vector<8x64xf32>
    %114 = arith.mulf %113, %108 : vector<8x64xf32>
    %115 = arith.addf %108, %114 : vector<8x64xf32>
    %cst_59 = arith.constant 0.797884583 : f32
    %116 = vector.broadcast %cst_59 : f32 to vector<8x64xf32>
    %117 = arith.mulf %116, %115 : vector<8x64xf32>
    %118 = math.tanh %117 : vector<8x64xf32>
    %cst_60 = arith.constant 1.000000e+00 : f32
    %119 = vector.broadcast %cst_60 : f32 to vector<8x64xf32>
    %120 = arith.addf %119, %118 : vector<8x64xf32>
    %121 = arith.mulf %110, %120 : vector<8x64xf32>
    %c0_61 = arith.constant 0 : index
    %c0_62 = arith.constant 0 : index
    %c0_63 = arith.constant 0 : index
    %122 = vector.load %arg14[%c0_61, %c0_62, %c0_63] : memref<2x64x32xf32, #tpu.memory_space<vmem>>, vector<1x64x32xf32>
    %123 = vector.shape_cast %122 : vector<1x64x32xf32> to vector<64x32xf32>
    %cst_64 = arith.constant dense<0.000000e+00> : vector<8x32xf32>
    %124 = tpu.matmul %121, %123, %cst_64 {dimension_numbers = #tpu.dot_dimension_numbers<[1], [0], [0], [1], [0, 0, 1, 1], [], []>} : vector<8x64xf32>, vector<64x32xf32>, vector<8x32xf32> -> vector<8x32xf32>
    %c0_65 = arith.constant 0 : index
    %c0_66 = arith.constant 0 : index
    %c0_67 = arith.constant 0 : index
    %125 = vector.load %arg15[%c0_65, %c0_66, %c0_67] : memref<2x1x32xf32, #tpu.memory_space<vmem>>, vector<1x1x32xf32>
    %126 = vector.shape_cast %125 : vector<1x1x32xf32> to vector<1x32xf32>
    %127 = vector.broadcast %126 : vector<1x32xf32> to vector<8x32xf32>
    %128 = arith.addf %124, %127 : vector<8x32xf32>
    %129 = arith.addf %101, %128 : vector<8x32xf32>
    %c0_68 = arith.constant 0 : index
    %c0_69 = arith.constant 0 : index
    %c0_70 = arith.constant 0 : index
    %130 = vector.load %arg16[%c0_68, %c0_69, %c0_70] : memref<2x1x32xf32, #tpu.memory_space<vmem>>, vector<1x1x32xf32>
    %131 = vector.shape_cast %130 : vector<1x1x32xf32> to vector<1x32xf32>
    %c0_71 = arith.constant 0 : index
    %c0_72 = arith.constant 0 : index
    %c0_73 = arith.constant 0 : index
    %132 = vector.load %arg17[%c0_71, %c0_72, %c0_73] : memref<2x1x32xf32, #tpu.memory_space<vmem>>, vector<1x1x32xf32>
    %133 = vector.shape_cast %132 : vector<1x1x32xf32> to vector<1x32xf32>
    %cst_74 = arith.constant dense<0.000000e+00> : vector<8xf32>
    %134 = vector.multi_reduction <add>, %129, %cst_74 [1] : vector<8x32xf32> to vector<8xf32>
    %135 = vector.shape_cast %134 : vector<8xf32> to vector<8x1xf32>
    %cst_75 = arith.constant 3.125000e-02 : f32
    %136 = vector.broadcast %cst_75 : f32 to vector<8x1xf32>
    %137 = arith.mulf %135, %136 : vector<8x1xf32>
    %138 = arith.mulf %129, %129 : vector<8x32xf32>
    %cst_76 = arith.constant dense<0.000000e+00> : vector<8xf32>
    %139 = vector.multi_reduction <add>, %138, %cst_76 [1] : vector<8x32xf32> to vector<8xf32>
    %140 = vector.shape_cast %139 : vector<8xf32> to vector<8x1xf32>
    %cst_77 = arith.constant 3.125000e-02 : f32
    %141 = vector.broadcast %cst_77 : f32 to vector<8x1xf32>
    %142 = arith.mulf %140, %141 : vector<8x1xf32>
    %143 = arith.mulf %137, %137 : vector<8x1xf32>
    %144 = arith.subf %142, %143 : vector<8x1xf32>
    %cst_78 = arith.constant 0.000000e+00 : f32
    %145 = vector.broadcast %cst_78 : f32 to vector<8x1xf32>
    %146 = arith.maximumf %144, %145 : vector<8x1xf32>
    %147 = vector.broadcast %137 : vector<8x1xf32> to vector<8x32xf32>
    %148 = arith.subf %129, %147 : vector<8x32xf32>
    %cst_79 = arith.constant 9.99999996E-13 : f32
    %149 = vector.broadcast %cst_79 : f32 to vector<8x1xf32>
    %150 = arith.addf %146, %149 : vector<8x1xf32>
    %151 = math.rsqrt %150 : vector<8x1xf32>
    %152 = vector.broadcast %151 : vector<8x1xf32> to vector<8x32xf32>
    %153 = arith.mulf %148, %152 : vector<8x32xf32>
    %154 = vector.broadcast %131 : vector<1x32xf32> to vector<8x32xf32>
    %155 = arith.mulf %153, %154 : vector<8x32xf32>
    %156 = vector.broadcast %133 : vector<1x32xf32> to vector<8x32xf32>
    %157 = arith.addf %155, %156 : vector<8x32xf32>
    %158 = vector.shape_cast %157 : vector<8x32xf32> to vector<1x8x32xf32>
    %159 = vector.broadcast %158 : vector<1x8x32xf32> to vector<6x8x32xf32>
    %c1 = arith.constant 1 : index
    %c0_80 = arith.constant 0 : index
    %c0_81 = arith.constant 0 : index
    %c0_82 = arith.constant 0 : index
    %160 = vector.load %arg6[%c1, %c0_80, %c0_81, %c0_82] : memref<2x6x32x16xf32, #tpu.memory_space<vmem>>, vector<1x6x32x16xf32>
    %161 = vector.shape_cast %160 : vector<1x6x32x16xf32> to vector<6x32x16xf32>
    "tpu.trace_start"() <{level = 10 : i32, message = "nsd,ndh->nsh"}> : () -> ()
    %cst_83 = arith.constant dense<0.000000e+00> : vector<6x8x16xf32>
    %162 = tpu.matmul %159, %161, %cst_83 {dimension_numbers = #tpu.dot_dimension_numbers<[2], [1], [1], [2], [0, 0, 0, 1, 1, 2], [0], [0]>} : vector<6x8x32xf32>, vector<6x32x16xf32>, vector<6x8x16xf32> -> vector<6x8x16xf32>
    "tpu.trace_stop"() : () -> ()
    %c1_84 = arith.constant 1 : index
    %c0_85 = arith.constant 0 : index
    %c0_86 = arith.constant 0 : index
    %c0_87 = arith.constant 0 : index
    %163 = vector.load %arg7[%c1_84, %c0_85, %c0_86, %c0_87] : memref<2x6x1x16xf32, #tpu.memory_space<vmem>>, vector<1x6x1x16xf32>
    %164 = vector.shape_cast %163 : vector<1x6x1x16xf32> to vector<6x1x16xf32>
    %165 = vector.broadcast %164 : vector<6x1x16xf32> to vector<6x8x16xf32>
    %166 = arith.addf %162, %165 : vector<6x8x16xf32>
    %167 = vector.extract_strided_slice %166 {offsets = [0, 0, 0], sizes = [2, 8, 16], strides = [1, 1, 1]} : vector<6x8x16xf32> to vector<2x8x16xf32>
    %168 = vector.extract_strided_slice %166 {offsets = [2, 0, 0], sizes = [2, 8, 16], strides = [1, 1, 1]} : vector<6x8x16xf32> to vector<2x8x16xf32>
    %169 = vector.extract_strided_slice %166 {offsets = [4, 0, 0], sizes = [2, 8, 16], strides = [1, 1, 1]} : vector<6x8x16xf32> to vector<2x8x16xf32>
    "tpu.trace_start"() <{level = 10 : i32, message = "nqd,nkd->nqk"}> : () -> ()
    %cst_88 = arith.constant dense<0.000000e+00> : vector<2x8x8xf32>
    %170 = tpu.matmul %167, %168, %cst_88 {dimension_numbers = #tpu.dot_dimension_numbers<[2], [2], [1], [1], [0, 0, 0, 1, 1, 1], [0], [0]>} : vector<2x8x16xf32>, vector<2x8x16xf32>, vector<2x8x8xf32> -> vector<2x8x8xf32>
    "tpu.trace_stop"() : () -> ()
    %cst_89 = arith.constant 2.500000e-01 : f32
    %171 = vector.broadcast %cst_89 : f32 to vector<2x8x8xf32>
    %172 = arith.mulf %170, %171 : vector<2x8x8xf32>
    %173 = vector.shape_cast %31 : vector<1x8xf32> to vector<1x1x8xf32>
    %174 = vector.broadcast %173 : vector<1x1x8xf32> to vector<2x8x8xf32>
    %175 = arith.addf %172, %174 : vector<2x8x8xf32>
    %cst_90 = arith.constant dense<0xFF800000> : vector<2x8xf32>
    %176 = vector.multi_reduction <maximumf>, %175, %cst_90 [2] : vector<2x8x8xf32> to vector<2x8xf32>
    %177 = vector.shape_cast %176 : vector<2x8xf32> to vector<2x8x1xf32>
    %178 = vector.broadcast %177 : vector<2x8x1xf32> to vector<2x8x8xf32>
    %179 = arith.subf %175, %178 : vector<2x8x8xf32>
    %180 = math.exp %179 : vector<2x8x8xf32>
    %cst_91 = arith.constant dense<0.000000e+00> : vector<2x8xf32>
    %181 = vector.multi_reduction <add>, %180, %cst_91 [2] : vector<2x8x8xf32> to vector<2x8xf32>
    %182 = vector.shape_cast %181 : vector<2x8xf32> to vector<2x8x1xf32>
    %183 = tpu.reciprocal %182 {approx = true} : vector<2x8x1xf32> -> vector<2x8x1xf32>
    %184 = vector.broadcast %183 : vector<2x8x1xf32> to vector<2x8x8xf32>
    %185 = arith.mulf %180, %184 : vector<2x8x8xf32>
    "tpu.trace_start"() <{level = 10 : i32, message = "nqk,nkd->nqd"}> : () -> ()
    %cst_92 = arith.constant dense<0.000000e+00> : vector<2x8x16xf32>
    %186 = tpu.matmul %185, %169, %cst_92 {dimension_numbers = #tpu.dot_dimension_numbers<[2], [1], [1], [2], [0, 0, 0, 1, 1, 2], [0], [0]>} : vector<2x8x8xf32>, vector<2x8x16xf32>, vector<2x8x16xf32> -> vector<2x8x16xf32>
    "tpu.trace_stop"() : () -> ()
    %c1_93 = arith.constant 1 : index
    %c0_94 = arith.constant 0 : index
    %c0_95 = arith.constant 0 : index
    %c0_96 = arith.constant 0 : index
    %187 = vector.load %arg8[%c1_93, %c0_94, %c0_95, %c0_96] : memref<2x2x16x32xf32, #tpu.memory_space<vmem>>, vector<1x2x16x32xf32>
    %188 = vector.shape_cast %187 : vector<1x2x16x32xf32> to vector<2x16x32xf32>
    "tpu.trace_start"() <{level = 10 : i32, message = "nsd,ndh->nsh"}> : () -> ()
    %cst_97 = arith.constant dense<0.000000e+00> : vector<2x8x32xf32>
    %189 = tpu.matmul %186, %188, %cst_97 {dimension_numbers = #tpu.dot_dimension_numbers<[2], [1], [1], [2], [0, 0, 0, 1, 1, 2], [0], [0]>} : vector<2x8x16xf32>, vector<2x16x32xf32>, vector<2x8x32xf32> -> vector<2x8x32xf32>
    "tpu.trace_stop"() : () -> ()
    %190 = vector.extract_strided_slice %189 {offsets = [0, 0, 0], sizes = [1, 8, 32], strides = [1, 1, 1]} : vector<2x8x32xf32> to vector<1x8x32xf32>
    %191 = vector.shape_cast %190 : vector<1x8x32xf32> to vector<8x32xf32>
    %192 = vector.extract_strided_slice %189 {offsets = [1, 0, 0], sizes = [1, 8, 32], strides = [1, 1, 1]} : vector<2x8x32xf32> to vector<1x8x32xf32>
    %193 = vector.shape_cast %192 : vector<1x8x32xf32> to vector<8x32xf32>
    %194 = arith.addf %191, %193 : vector<8x32xf32>
    %c1_98 = arith.constant 1 : index
    %c0_99 = arith.constant 0 : index
    %c0_100 = arith.constant 0 : index
    %195 = vector.load %arg9[%c1_98, %c0_99, %c0_100] : memref<2x1x32xf32, #tpu.memory_space<vmem>>, vector<1x1x32xf32>
    %196 = vector.shape_cast %195 : vector<1x1x32xf32> to vector<1x32xf32>
    %197 = vector.broadcast %196 : vector<1x32xf32> to vector<8x32xf32>
    %198 = arith.addf %194, %197 : vector<8x32xf32>
    %199 = arith.addf %157, %198 : vector<8x32xf32>
    %c1_101 = arith.constant 1 : index
    %c0_102 = arith.constant 0 : index
    %c0_103 = arith.constant 0 : index
    %200 = vector.load %arg10[%c1_101, %c0_102, %c0_103] : memref<2x1x32xf32, #tpu.memory_space<vmem>>, vector<1x1x32xf32>
    %201 = vector.shape_cast %200 : vector<1x1x32xf32> to vector<1x32xf32>
    %c1_104 = arith.constant 1 : index
    %c0_105 = arith.constant 0 : index
    %c0_106 = arith.constant 0 : index
    %202 = vector.load %arg11[%c1_104, %c0_105, %c0_106] : memref<2x1x32xf32, #tpu.memory_space<vmem>>, vector<1x1x32xf32>
    %203 = vector.shape_cast %202 : vector<1x1x32xf32> to vector<1x32xf32>
    %cst_107 = arith.constant dense<0.000000e+00> : vector<8xf32>
    %204 = vector.multi_reduction <add>, %199, %cst_107 [1] : vector<8x32xf32> to vector<8xf32>
    %205 = vector.shape_cast %204 : vector<8xf32> to vector<8x1xf32>
    %cst_108 = arith.constant 3.125000e-02 : f32
    %206 = vector.broadcast %cst_108 : f32 to vector<8x1xf32>
    %207 = arith.mulf %205, %206 : vector<8x1xf32>
    %208 = arith.mulf %199, %199 : vector<8x32xf32>
    %cst_109 = arith.constant dense<0.000000e+00> : vector<8xf32>
    %209 = vector.multi_reduction <add>, %208, %cst_109 [1] : vector<8x32xf32> to vector<8xf32>
    %210 = vector.shape_cast %209 : vector<8xf32> to vector<8x1xf32>
    %cst_110 = arith.constant 3.125000e-02 : f32
    %211 = vector.broadcast %cst_110 : f32 to vector<8x1xf32>
    %212 = arith.mulf %210, %211 : vector<8x1xf32>
    %213 = arith.mulf %207, %207 : vector<8x1xf32>
    %214 = arith.subf %212, %213 : vector<8x1xf32>
    %cst_111 = arith.constant 0.000000e+00 : f32
    %215 = vector.broadcast %cst_111 : f32 to vector<8x1xf32>
    %216 = arith.maximumf %214, %215 : vector<8x1xf32>
    %217 = vector.broadcast %207 : vector<8x1xf32> to vector<8x32xf32>
    %218 = arith.subf %199, %217 : vector<8x32xf32>
    %cst_112 = arith.constant 9.99999996E-13 : f32
    %219 = vector.broadcast %cst_112 : f32 to vector<8x1xf32>
    %220 = arith.addf %216, %219 : vector<8x1xf32>
    %221 = math.rsqrt %220 : vector<8x1xf32>
    %222 = vector.broadcast %221 : vector<8x1xf32> to vector<8x32xf32>
    %223 = arith.mulf %218, %222 : vector<8x32xf32>
    %224 = vector.broadcast %201 : vector<1x32xf32> to vector<8x32xf32>
    %225 = arith.mulf %223, %224 : vector<8x32xf32>
    %226 = vector.broadcast %203 : vector<1x32xf32> to vector<8x32xf32>
    %227 = arith.addf %225, %226 : vector<8x32xf32>
    %c1_113 = arith.constant 1 : index
    %c0_114 = arith.constant 0 : index
    %c0_115 = arith.constant 0 : index
    %228 = vector.load %arg12[%c1_113, %c0_114, %c0_115] : memref<2x32x64xf32, #tpu.memory_space<vmem>>, vector<1x32x64xf32>
    %229 = vector.shape_cast %228 : vector<1x32x64xf32> to vector<32x64xf32>
    %cst_116 = arith.constant dense<0.000000e+00> : vector<8x64xf32>
    %230 = tpu.matmul %227, %229, %cst_116 {dimension_numbers = #tpu.dot_dimension_numbers<[1], [0], [0], [1], [0, 0, 1, 1], [], []>} : vector<8x32xf32>, vector<32x64xf32>, vector<8x64xf32> -> vector<8x64xf32>
    %c1_117 = arith.constant 1 : index
    %c0_118 = arith.constant 0 : index
    %c0_119 = arith.constant 0 : index
    %231 = vector.load %arg13[%c1_117, %c0_118, %c0_119] : memref<2x1x64xf32, #tpu.memory_space<vmem>>, vector<1x1x64xf32>
    %232 = vector.shape_cast %231 : vector<1x1x64xf32> to vector<1x64xf32>
    %233 = vector.broadcast %232 : vector<1x64xf32> to vector<8x64xf32>
    %234 = arith.addf %230, %233 : vector<8x64xf32>
    %cst_120 = arith.constant 5.000000e-01 : f32
    %235 = vector.broadcast %cst_120 : f32 to vector<8x64xf32>
    %236 = arith.mulf %235, %234 : vector<8x64xf32>
    %cst_121 = arith.constant 4.471500e-02 : f32
    %237 = vector.broadcast %cst_121 : f32 to vector<8x64xf32>
    %238 = arith.mulf %237, %234 : vector<8x64xf32>
    %239 = arith.mulf %238, %234 : vector<8x64xf32>
    %240 = arith.mulf %239, %234 : vector<8x64xf32>
    %241 = arith.addf %234, %240 : vector<8x64xf32>
    %cst_122 = arith.constant 0.797884583 : f32
    %242 = vector.broadcast %cst_122 : f32 to vector<8x64xf32>
    %243 = arith.mulf %242, %241 : vector<8x64xf32>
    %244 = math.tanh %243 : vector<8x64xf32>
    %cst_123 = arith.constant 1.000000e+00 : f32
    %245 = vector.broadcast %cst_123 : f32 to vector<8x64xf32>
    %246 = arith.addf %245, %244 : vector<8x64xf32>
    %247 = arith.mulf %236, %246 : vector<8x64xf32>
    %c1_124 = arith.constant 1 : index
    %c0_125 = arith.constant 0 : index
    %c0_126 = arith.constant 0 : index
    %248 = vector.load %arg14[%c1_124, %c0_125, %c0_126] : memref<2x64x32xf32, #tpu.memory_space<vmem>>, vector<1x64x32xf32>
    %249 = vector.shape_cast %248 : vector<1x64x32xf32> to vector<64x32xf32>
    %cst_127 = arith.constant dense<0.000000e+00> : vector<8x32xf32>
    %250 = tpu.matmul %247, %249, %cst_127 {dimension_numbers = #tpu.dot_dimension_numbers<[1], [0], [0], [1], [0, 0, 1, 1], [], []>} : vector<8x64xf32>, vector<64x32xf32>, vector<8x32xf32> -> vector<8x32xf32>
    %c1_128 = arith.constant 1 : index
    %c0_129 = arith.constant 0 : index
    %c0_130 = arith.constant 0 : index
    %251 = vector.load %arg15[%c1_128, %c0_129, %c0_130] : memref<2x1x32xf32, #tpu.memory_space<vmem>>, vector<1x1x32xf32>
    %252 = vector.shape_cast %251 : vector<1x1x32xf32> to vector<1x32xf32>
    %253 = vector.broadcast %252 : vector<1x32xf32> to vector<8x32xf32>
    %254 = arith.addf %250, %253 : vector<8x32xf32>
    %255 = arith.addf %227, %254 : vector<8x32xf32>
    %c1_131 = arith.constant 1 : index
    %c0_132 = arith.constant 0 : index
    %c0_133 = arith.constant 0 : index
    %256 = vector.load %arg16[%c1_131, %c0_132, %c0_133] : memref<2x1x32xf32, #tpu.memory_space<vmem>>, vector<1x1x32xf32>
    %257 = vector.shape_cast %256 : vector<1x1x32xf32> to vector<1x32xf32>
    %c1_134 = arith.constant 1 : index
    %c0_135 = arith.constant 0 : index
    %c0_136 = arith.constant 0 : index
    %258 = vector.load %arg17[%c1_134, %c0_135, %c0_136] : memref<2x1x32xf32, #tpu.memory_space<vmem>>, vector<1x1x32xf32>
    %259 = vector.shape_cast %258 : vector<1x1x32xf32> to vector<1x32xf32>
    %cst_137 = arith.constant dense<0.000000e+00> : vector<8xf32>
    %260 = vector.multi_reduction <add>, %255, %cst_137 [1] : vector<8x32xf32> to vector<8xf32>
    %261 = vector.shape_cast %260 : vector<8xf32> to vector<8x1xf32>
    %cst_138 = arith.constant 3.125000e-02 : f32
    %262 = vector.broadcast %cst_138 : f32 to vector<8x1xf32>
    %263 = arith.mulf %261, %262 : vector<8x1xf32>
    %264 = arith.mulf %255, %255 : vector<8x32xf32>
    %cst_139 = arith.constant dense<0.000000e+00> : vector<8xf32>
    %265 = vector.multi_reduction <add>, %264, %cst_139 [1] : vector<8x32xf32> to vector<8xf32>
    %266 = vector.shape_cast %265 : vector<8xf32> to vector<8x1xf32>
    %cst_140 = arith.constant 3.125000e-02 : f32
    %267 = vector.broadcast %cst_140 : f32 to vector<8x1xf32>
    %268 = arith.mulf %266, %267 : vector<8x1xf32>
    %269 = arith.mulf %263, %263 : vector<8x1xf32>
    %270 = arith.subf %268, %269 : vector<8x1xf32>
    %cst_141 = arith.constant 0.000000e+00 : f32
    %271 = vector.broadcast %cst_141 : f32 to vector<8x1xf32>
    %272 = arith.maximumf %270, %271 : vector<8x1xf32>
    %273 = vector.broadcast %263 : vector<8x1xf32> to vector<8x32xf32>
    %274 = arith.subf %255, %273 : vector<8x32xf32>
    %cst_142 = arith.constant 9.99999996E-13 : f32
    %275 = vector.broadcast %cst_142 : f32 to vector<8x1xf32>
    %276 = arith.addf %272, %275 : vector<8x1xf32>
    %277 = math.rsqrt %276 : vector<8x1xf32>
    %278 = vector.broadcast %277 : vector<8x1xf32> to vector<8x32xf32>
    %279 = arith.mulf %274, %278 : vector<8x32xf32>
    %280 = vector.broadcast %257 : vector<1x32xf32> to vector<8x32xf32>
    %281 = arith.mulf %279, %280 : vector<8x32xf32>
    %282 = vector.broadcast %259 : vector<1x32xf32> to vector<8x32xf32>
    %283 = arith.addf %281, %282 : vector<8x32xf32>
    %284 = vector.extract_strided_slice %283 {offsets = [0, 0], sizes = [1, 32], strides = [1, 1]} : vector<8x32xf32> to vector<1x32xf32>
    %285 = vector.shape_cast %284 : vector<1x32xf32> to vector<1x1x32xf32>
    %c0_143 = arith.constant 0 : index
    %c0_144 = arith.constant 0 : index
    %c0_145 = arith.constant 0 : index
    %286 = vector.load %arg18[%c0_143, %c0_144, %c0_145] : memref<1x1x32xf32, #tpu.memory_space<vmem>>, vector<1x1x32xf32>
    tpu.vector_store %arg18[%c0_143, %c0_144, %c0_145], %285 {strides = array<i32>} : memref<1x1x32xf32, #tpu.memory_space<vmem>>, vector<1x1x32xf32>,
    return
  }
  func.func @transform_0(%arg0: i32) -> (i32, i32, i32) {
    %c0_i32 = arith.constant 0 : i32
    %c0_i32_0 = arith.constant 0 : i32
    %c0_i32_1 = arith.constant 0 : i32
    return %arg0, %c0_i32, %c0_i32_0 : i32, i32, i32
  }
  func.func @transform_1(%arg0: i32) -> (i32, i32, i32) {
    %c0_i32 = arith.constant 0 : i32
    %c0_i32_0 = arith.constant 0 : i32
    %c0_i32_1 = arith.constant 0 : i32
    return %arg0, %c0_i32, %c0_i32_0 : i32, i32, i32
  }
  func.func @transform_2(%arg0: i32) -> (i32, i32) {
    %c0_i32 = arith.constant 0 : i32
    %c0_i32_0 = arith.constant 0 : i32
    %c0_i32_1 = arith.constant 0 : i32
    return %c0_i32, %c0_i32_0 : i32, i32
  }
  func.func @transform_3(%arg0: i32) -> (i32, i32) {
    %c0_i32 = arith.constant 0 : i32
    %c0_i32_0 = arith.constant 0 : i32
    %c0_i32_1 = arith.constant 0 : i32
    return %c0_i32, %c0_i32_0 : i32, i32
  }
  func.func @transform_4(%arg0: i32) -> (i32, i32) {
    %c0_i32 = arith.constant 0 : i32
    %c0_i32_0 = arith.constant 0 : i32
    %c0_i32_1 = arith.constant 0 : i32
    return %c0_i32, %c0_i32_0 : i32, i32
  }
  func.func @transform_5(%arg0: i32) -> (i32, i32, i32, i32) {
    %c0_i32 = arith.constant 0 : i32
    %c0_i32_0 = arith.constant 0 : i32
    %c0_i32_1 = arith.constant 0 : i32
    %c0_i32_2 = arith.constant 0 : i32
    %c0_i32_3 = arith.constant 0 : i32
    return %c0_i32, %c0_i32_0, %c0_i32_1, %c0_i32_2 : i32, i32, i32, i32
  }
  func.func @transform_6(%arg0: i32) -> (i32, i32, i32, i32) {
    %c0_i32 = arith.constant 0 : i32
    %c0_i32_0 = arith.constant 0 : i32
    %c0_i32_1 = arith.constant 0 : i32
    %c0_i32_2 = arith.constant 0 : i32
    %c0_i32_3 = arith.constant 0 : i32
    return %c0_i32, %c0_i32_0, %c0_i32_1, %c0_i32_2 : i32, i32, i32, i32
  }
  func.func @transform_7(%arg0: i32) -> (i32, i32, i32, i32) {
    %c0_i32 = arith.constant 0 : i32
    %c0_i32_0 = arith.constant 0 : i32
    %c0_i32_1 = arith.constant 0 : i32
    %c0_i32_2 = arith.constant 0 : i32
    %c0_i32_3 = arith.constant 0 : i32
    return %c0_i32, %c0_i32_0, %c0_i32_1, %c0_i32_2 : i32, i32, i32, i32
  }
  func.func @transform_8(%arg0: i32) -> (i32, i32, i32) {
    %c0_i32 = arith.constant 0 : i32
    %c0_i32_0 = arith.constant 0 : i32
    %c0_i32_1 = arith.constant 0 : i32
    %c0_i32_2 = arith.constant 0 : i32
    return %c0_i32, %c0_i32_0, %c0_i32_1 : i32, i32, i32
  }
  func.func @transform_9(%arg0: i32) -> (i32, i32, i32) {
    %c0_i32 = arith.constant 0 : i32
    %c0_i32_0 = arith.constant 0 : i32
    %c0_i32_1 = arith.constant 0 : i32
    %c0_i32_2 = arith.constant 0 : i32
    return %c0_i32, %c0_i32_0, %c0_i32_1 : i32, i32, i32
  }
  func.func @transform_10(%arg0: i32) -> (i32, i32, i32) {
    %c0_i32 = arith.constant 0 : i32
    %c0_i32_0 = arith.constant 0 : i32
    %c0_i32_1 = arith.constant 0 : i32
    %c0_i32_2 = arith.constant 0 : i32
    return %c0_i32, %c0_i32_0, %c0_i32_1 : i32, i32, i32
  }
  func.func @transform_11(%arg0: i32) -> (i32, i32, i32) {
    %c0_i32 = arith.constant 0 : i32
    %c0_i32_0 = arith.constant 0 : i32
    %c0_i32_1 = arith.constant 0 : i32
    %c0_i32_2 = arith.constant 0 : i32
    return %c0_i32, %c0_i32_0, %c0_i32_1 : i32, i32, i32
  }
  func.func @transform_12(%arg0: i32) -> (i32, i32, i32) {
    %c0_i32 = arith.constant 0 : i32
    %c0_i32_0 = arith.constant 0 : i32
    %c0_i32_1 = arith.constant 0 : i32
    %c0_i32_2 = arith.constant 0 : i32
    return %c0_i32, %c0_i32_0, %c0_i32_1 : i32, i32, i32
  }
  func.func @transform_13(%arg0: i32) -> (i32, i32, i32) {
    %c0_i32 = arith.constant 0 : i32
    %c0_i32_0 = arith.constant 0 : i32
    %c0_i32_1 = arith.constant 0 : i32
    %c0_i32_2 = arith.constant 0 : i32
    return %c0_i32, %c0_i32_0, %c0_i32_1 : i32, i32, i32
  }
  func.func @transform_14(%arg0: i32) -> (i32, i32, i32) {
    %c0_i32 = arith.constant 0 : i32
    %c0_i32_0 = arith.constant 0 : i32
    %c0_i32_1 = arith.constant 0 : i32
    %c0_i32_2 = arith.constant 0 : i32
    return %c0_i32, %c0_i32_0, %c0_i32_1 : i32, i32, i32
  }
  func.func @transform_15(%arg0: i32) -> (i32, i32, i32) {
    %c0_i32 = arith.constant 0 : i32
    %c0_i32_0 = arith.constant 0 : i32
    %c0_i32_1 = arith.constant 0 : i32
    %c0_i32_2 = arith.constant 0 : i32
    return %c0_i32, %c0_i32_0, %c0_i32_1 : i32, i32, i32
  }
  func.func @transform_16(%arg0: i32) -> (i32, i32, i32) {
    %c0_i32 = arith.constant 0 : i32
    %c0_i32_0 = arith.constant 0 : i32
    %c0_i32_1 = arith.constant 0 : i32
    %c0_i32_2 = arith.constant 0 : i32
    return %c0_i32, %c0_i32_0, %c0_i32_1 : i32, i32, i32
  }
  func.func @transform_17(%arg0: i32) -> (i32, i32, i32) {
    %c0_i32 = arith.constant 0 : i32
    %c0_i32_0 = arith.constant 0 : i32
    %c0_i32_1 = arith.constant 0 : i32
    return %arg0, %c0_i32, %c0_i32_0 : i32, i32, i32
  }
}

</mosaic_0001>

<bundles_post_ra>
// kernel: tpu_custom_call.1
= control target key start
LH: loop header
LB: loop body
LE: loop exit
PB: predicated region body
PF: predicated region fallthrough
CT: control target
= control target key end

     0   :  { %s2544_s0 = inlined_call_operand.vmem [shape: f32[2,8,32], index: 0, kind: input, shape index: {}]   ;;  %s2545_s1 = inlined_call_operand.vmem [shape: f32[2,1,8], index: 1, kind: input, shape index: {}]   ;;  %s2546_s2 = inlined_call_operand.vmem [shape: f32[8,32], index: 2, kind: input, shape index: {}]   ;;  %s2547_s3 = inlined_call_operand.vmem [shape: f32[1,32], index: 3, kind: input, shape index: {}]   ;;  %s2548_s4 = inlined_call_operand.vmem [shape: f32[1,32], index: 4, kind: input, shape index: {}]   ;;  %s2549_s5 = inlined_call_operand.vmem [shape: f32[2,6,32,16], index: 5, kind: input, shape index: {}]   ;;  %s2550_s6 = inlined_call_operand.vmem [shape: f32[2,6,1,16], index: 6, kind: input, shape index: {}]   ;;  %s2551_s7 = inlined_call_operand.vmem [shape: f32[2,2,16,32], index: 7, kind: input, shape index: {}]   ;;  %s2552_s8 = inlined_call_operand.vmem [shape: f32[2,1,32], index: 8, kind: input, shape index: {}]   ;;  %s2553_s9 = inlined_call_operand.vmem [shape: f32[2,1,32], index: 9, kind: input, shape index: {}]   ;;  %s2554_s10 = inlined_call_operand.vmem [shape: f32[2,1,32], index: 10, kind: input, shape index: {}]   ;;  %s2555_s11 = inlined_call_operand.vmem [shape: f32[2,32,64], index: 11, kind: input, shape index: {}]   ;;  %s2556_s12 = inlined_call_operand.vmem [shape: f32[2,1,64], index: 12, kind: input, shape index: {}]   ;;  %s2557_s13 = inlined_call_operand.vmem [shape: f32[2,64,32], index: 13, kind: input, shape index: {}]   ;;  %s2558_s14 = inlined_call_operand.vmem [shape: f32[2,1,32], index: 14, kind: input, shape index: {}]   ;;  %s2559_s15 = inlined_call_operand.vmem [shape: f32[2,1,32], index: 15, kind: input, shape index: {}]   ;;  %s2560_s16 = inlined_call_operand.vmem [shape: f32[2,1,32], index: 16, kind: input, shape index: {}]   ;;  %s2561_s17 = inlined_call_operand.hbm [shape: f32[2,1,32], index: 17, kind: output, shape index: {}]  }
   0x1   :  { %2569 = sst [smem:[#allocation11_spill]] %s2544_s0 }
   0x2   :  { %2570 = sst [smem:[#allocation12_spill]] %s2545_s1 }
   0x3   :  { %2571 = sst [smem:[#allocation13_spill]] %s2546_s2 }
   0x4   :  { %2572 = sst [smem:[#allocation14_spill]] %s2547_s3 }
   0x5   :  { %22 = vsyncpa [#allocation3], 0 }
   0x6   :  { %24 = vsyncpa [#allocation3 + $0x1], 0  ;;  %s2034_s24 = smov 0   ;;  %s2036_s25 = smov 0  }
   0x7   :  { %s2038_s26 = smov 0   ;;  %s2040_s27 = smov 0  }
   0x8 LB: > { %2573 = sst [smem:[#allocation5_spill]] %s1930_s24  ;;  %s2055_s28 = sadd.s32 4294967295, %s1942_s27   ;;  %s1942_s27 = sphi %s2040_s27, %s2589_s27   ;;  %s1938_s26 = sphi %s2038_s26, %s2591_s26   ;;  %s1934_s25 = sphi %s2036_s25, %s2593_s25   ;;  %s1930_s24 = sphi %s2034_s24, %s2592_s24  }
   0x9   : > { %2574 = sst [smem:[#allocation6_spill]] %s1938_s26  ;;  %s1690_s29 = sadd.s32 4294967294, %s1942_s27  }
   0xa   : > { %2575 = sst [smem:[#allocation7_spill]] %s1942_s27  ;;  %s2059_s0 = sadd.s32 1, %s1942_s27  }
   0xb   : > { %2576 = sst [smem:[#allocation8_spill]] %s2059_s0  ;;  %s404_s30 = sadd.s32 1, %s1938_s26 }
   0xc   : > { %s401_s18 = ssub.s32 %s1942_s27, %s2059_s0  ;;  %p414_p0 = scmp.ne.s32.totalorder %s1938_s26, %s1934_s25 }
   0xd   : > { %p402_p1 = scmp.eq.s32.totalorder %s401_s18, 0  ;;  %p415_p2 = scmp.eq.s32.totalorder %s2055_s28, 1 }
   0xe   : > { %p420_p3 = scmp.ne.s32.totalorder %s1934_s25, %s1930_s24  ;;  %p421_p4 = scmp.eq.s32.totalorder %s1690_s29, 1 }
   0xf   : > { %s2070_s19 = scalar_select %p402_p1, %s1938_s26, %s404_s30  }
  0x10   : > { %p2072_p5 = por %p415_p2, %p414_p0  ;;  %p2076_p6 = por %p421_p4, %p420_p3 }
  0x11   : > { %2577 = sst [smem:[#allocation9_spill]] %s2070_s19  ;;  %p1693_p7 = scmp.ge.s32.totalorder %s1942_s27, 1 }
  0x12   : > { %s2579_s20 = scalar_select %p2076_p6, 1, 0 }
  0x13   : > { %p497_p8 = scmp.lt.s32.totalorder %s1942_s27, 3 }
  0x14   : > { %2580 = sst [smem:[#allocation10_spill]] %s2579_s20 }
  0x15   : > { %p498_p9 = pnand %p1693_p7, %p497_p8 }
  0x16   : > { %p550_p10 = scmp.lt.s32.totalorder (!%p498_p9), %s2055_s28, 1  ;;  %s2581_s30 = sld [smem:[#allocation12_spill]] (!%p498_p9) }
  0x17   : > { %501 = sbr.rel (%p498_p9) target bundleno = 2961 (0xb91), region = 88  ;;  %s2582_s2 = sld [smem:[#allocation13_spill]] (!%p498_p9) }
  0x18   : > { %s2583_s24 = sld [smem:[#allocation11_spill]] (!%p498_p9)  ;;  %s548_s19 = sand.u32 (!%p498_p9), 1, %s1934_s25  }
  0x19   : > { %s2584_s3 = sld [smem:[#allocation14_spill]] (!%p498_p9)  ;;  %s549_s23 = scalar_lea.vmem (!%p498_p9), [#allocation2], %s548_s19 }
  0x1a   : > { %s1624_s29 = sshll.u32 (!%p498_p9), %s549_s23, 4  ;;  %s1625_s29 = int_to_ptr.vmem [resolvable:$true] %s1624_s29 }
  0x1c   : > { %s2084_s21 = scalar_select %p550_p10, %s2055_s28, 1  ;;  %vm562_vm0 = vcmask 261120   ;;  %v600_v7 = vld [vmem:[%s2549_s5 + $0x18] sm:$0xff]  ;;  %v599_v11 = vld [vmem:[%s2549_s5 + $0x10] sm:$0xff]  ;;  %v598_v16 = vld [vmem:[%s2549_s5 + $0x8] sm:$0xff]  ;;  %vm768_vm4 = vcmask 130048  }
  0x1d   : > { %v558_v0 = vld [vmem:[%s2582_s2] sm:$0xff]  ;;  %v608_v8 = vld [vmem:[%s2549_s5 + $0x58] sm:$0xff]  ;;  %660 = vmatpush.msra.mxu1 %v600_v7  ;;  %v607_v12 = vld [vmem:[%s2549_s5 + $0x50] sm:$0xff]  ;;  %vm828_vm5 = vcmask 64512   ;;  %vm1041_vm9 = vcmask 523264  }
  0x1e   : > { %s1694_s22 = sshll.u32 %s2084_s21, 3  ;;  %v612_v9 = vld [vmem:[%s2549_s5 + $0x78] sm:$0xff]  ;;  %700 = vmatpush.msra.mxu2 %v608_v8  ;;  %v611_v13 = vld [vmem:[%s2549_s5 + $0x70] sm:$0xff]  ;;  %v606_v17 = vld [vmem:[%s2549_s5 + $0x48] sm:$0xff] }
  0x1f   : > { %s553_s27 = scalar_lea.vmem %s2583_s24, %s1694_s22  ;;  %v616_v10 = vld [vmem:[%s2549_s5 + $0x98] sm:$0xff]  ;;  %720 = vmatpush.msra.mxu3 %v612_v9  ;;  %661 = vmatpush.msra.mxu1 %v599_v11  ;;  %v615_v14 = vld [vmem:[%s2549_s5 + $0x90] sm:$0xff]  ;;  %v610_v18 = vld [vmem:[%s2549_s5 + $0x68] sm:$0xff]  ;;  %s2585_s22 = scalar_lea.vmem %s2581_s30, %s2084_s21 }
  0x20   : > { %v557_v1 = vld [vmem:[%s553_s27] sm:$0xff]  ;;  %740 = vmatpush.msra.mxu0 %v616_v10  ;;  %701 = vmatpush.msra.mxu2 %v607_v12  ;;  %v614_v19 = vld [vmem:[%s2549_s5 + $0x88] sm:$0xff]  ;;  %v604_v27 = vld [vmem:[%s2549_s5 + $0x38] sm:$0xff]  ;;  %s1614_s24 = scalar_lea.sflag [#allocation3], %s548_s19  ;;  %s1900_s21 = scalar_lea.hbm %s2561_s17, 2 }
  0x21   : > { %v2097_v2 = vadd.f32 %v558_v0, %v557_v1  ;;  %721 = vmatpush.msra.mxu3 %v611_v13  ;;  %662 = vmatpush.msra.mxu1 %v598_v16  ;;  %v597_v20 = vld [vmem:[%s2549_s5] sm:$0xff]  ;;  %v603_v28 = vld [vmem:[%s2549_s5 + $0x30] sm:$0xff]  ;;  %v602_v30 = vld [vmem:[%s2549_s5 + $0x28] sm:$0xff] }
  0x22   : > { %741 = vmatpush.msra.mxu0 %v615_v14  ;;  %702 = vmatpush.msra.mxu2 %v606_v17  ;;  %v605_v21 = vld [vmem:[%s2549_s5 + $0x40] sm:$0xff]  ;;  %v620_v47 = vld [vmem:[%s2549_s5 + $0xb8] sm:$0xff]  ;;  %v619_v48 = vld [vmem:[%s2549_s5 + $0xb0] sm:$0xff] }
  0x23   : > { %v563_v3 = vsel %vm562_vm0, %v2097_v2, 0.0  ;;  %v567_v4 = vmul.f32 %v2097_v2, %v2097_v2  ;;  %722 = vmatpush.msra.mxu3 %v610_v18  ;;  %v609_v22 = vld [vmem:[%s2549_s5 + $0x60] sm:$0xff]  ;;  %663 = vmatpush.msra.mxu1 %v597_v20  ;;  %v618_v49 = vld [vmem:[%s2549_s5 + $0xa8] sm:$0xff] }
  0x24   : > { %564 = vadd.xlane.f32.xlu0 %v563_v3  ;;  %742 = vmatpush.msra.mxu0 %v614_v19  ;;  %v613_v24 = vld [vmem:[%s2549_s5 + $0x80] sm:$0xff] }
  0x25   : > { %v568_v5 = vsel %vm562_vm0, %v567_v4, 0.0  ;;  %703 = vmatpush.msra.mxu2 %v605_v21  ;;  %723 = vmatpush.msra.mxu3 %v609_v22  ;;  %v601_v32 = vld [vmem:[%s2549_s5 + $0x20] sm:$0xff] }
  0x26   : > { %743 = vmatpush.msra.mxu0 %v613_v24  ;;  %680 = vmatpush.msrb.mxu1 %v604_v27  ;;  %v1821_v41 = vld [vmem:[%s2584_s3] ss:$0 sm:$0xff]  ;;  %v1824_v51 = vld [vmem:[%s2550_s6 + $0x4] ss:$0 sm:$0xff]  ;;  %v1825_v55 = vld [vmem:[%s2550_s6 + $0x2] ss:$0 sm:$0xff] }
  0x27   : > { %v1822_v43 = vld [vmem:[%s2548_s4] ss:$0 sm:$0xff]  ;;  %v1826_v56 = vld [vmem:[%s2550_s6 + $0x3] ss:$0 sm:$0xff]  ;;  %v1827_v57 = vld [vmem:[%s2550_s6 + $0x1] ss:$0 sm:$0xff] }
  0x28   : > { %681 = vmatpush.msrb.mxu1 %v603_v28  ;;  %v617_v50 = vld [vmem:[%s2549_s5 + $0xa0] sm:$0xff]  ;;  %v898_v24 = vld [vmem:[%s2551_s7 + $0x8] sm:$0xff] }
  0x29   : > { %v1823_v58 = vld [vmem:[%s2550_s6] ss:$0 sm:$0xff] }
  0x2a   : > { %682 = vmatpush.msrb.mxu1 %v602_v30 }
  0x2c   : > { %569 = vadd.xlane.f32.xlu0 %v568_v5  ;;  %683 = vmatpush.msrb.mxu1 %v601_v32  ;;  %v2224_v5 = vld [vmem:[%s2585_s22] ss:$0 sm:$0xff]  ;;  %v900_v32 = vld [vmem:[%s2551_s7 + $0x18] sm:$0xff]  ;;  %s1622_s22 = scalar_lea.hbm %s2561_s17, %s2055_s28 }
  0x2d   : > { %s1626_s26 = sshll.u32 %s1622_s22, 4  ;;  %s1627_s26 = int_to_ptr.hbm [resolvable:$true] %s1626_s26 }
  0x2e   : > { %s1894_s27 = sshra.s32 %s1627_s26, 4  ;;  %s1895_s27 = int_to_ptr.hbm [resolvable:$true] %s1894_s27 }
  0x2f   : > { %s1896_s28 = scalar_lea.hbm %s1895_s27, 1  ;;  %p1901_p0 = scmp.lt.s32.totalorder %s1895_s27, %s2561_s17 }
  0x30   : > { %p1897_p11 = scmp.ne.s32.totalorder %s1895_s27, %s1896_s28  ;;  %p1902_p1 = scmp.lt.s32.totalorder %s1900_s21, %s1896_s28 }
  0x32   : > { %p1898_p12 = pnand %p1897_p11, %p2072_p5  ;;  %p1903_p2 = por %p1902_p1, %p1901_p0 }
  0x34   : > { %p1899_p13 = pneg %p1898_p12 }
  0x36   : > { %p1904_p3 = pnand %p1903_p2, %p1899_p13 }
  0x97   : > { %v565_v6 = vpop.xlane.xlu0 %564 }
  0x98   : > { %v566_v15 = vmul.f32 0.03125, %v565_v6 }
  0x9a   : > { %v572_v25 = vmul.f32 %v566_v15, %v566_v15  ;;  %v575_v40 = vsub.f32 %v2097_v2, %v566_v15  ;;  %v1828_v2 = vld [vmem:[%s2550_s6 + $0x5] ss:$0 sm:$0xff] }
  0x9f   : > { %v570_v23 = vpop.xlane.xlu0 %569 }
  0xa0   : > { %v571_v26 = vmul.f32 0.03125, %v570_v23 }
  0xa2   : > { %v573_v29 = vsub.f32 %v571_v26, %v572_v25 }
  0xa4   : > { %v574_v31 = vmax.f32 %v573_v29, 0.0 }
  0xa6   : > { %v576_v33 = vadd.f32 1e-12, %v574_v31  ;;  %v897_v31 = vld [vmem:[%s2551_s7] sm:$0xff] }
  0xa8   : > { %1850 = vrsqrt.f32 %v576_v33  ;;  %vm583_vm2 = vweird.f32 %v576_v33 }
  0xae   : > { %v1851_v34 = vpop.eup %1850 }
  0xaf   : > { %v578_v35 = vmul.f32 %v1851_v34, %v576_v33  ;;  %vm584_vm1 = vweird.f32 %v1851_v34  ;;  %v899_v33 = vld [vmem:[%s2551_s7 + $0x10] sm:$0xff] }
  0xb0   : > { %vm585_vm3 = vmor %vm583_vm2, %vm584_vm1 }
  0xb1   : > { %v579_v36 = vmul.f32 %v1851_v34, %v578_v35 }
  0xb3   : > { %v580_v37 = vmul.f32 0.5, %v579_v36  ;;  %v1830_v36 = vld [vmem:[%s2552_s8] ss:$0 sm:$0xff] }
  0xb5   : > { %v581_v38 = vsub.f32 1.5, %v580_v37 }
  0xb7   : > { %v582_v39 = vmul.f32 %v1851_v34, %v581_v38 }
  0xb9   : > { %v586_v42 = vsel %vm585_vm3, %v1851_v34, %v582_v39  ;;  %vm1611_vm3 = vcmask 253952  }
  0xba   : > { %v587_v44 = vmul.f32 %v586_v42, %v575_v40 }
  0xbc   : > { %v591_v45 = vmul.f32 %v1821_v41, %v587_v44 }
  0xbe   : > { %v2171_v46 = vadd.f32 %v1822_v43, %v591_v45  ;;  %v992_v45 = vld [vmem:[%s2555_s11 + $0x18] sm:$0xff] }
  0xc0   : > { %1695 = vmatmul.msk.f32.vlgmr.msra.gmra.mxu1 %vm562_vm0, %v2171_v46  ;;  %1697 = vmatmul.msk.f32.vlgmr.msra.gmra.mxu2 %vm562_vm0, %v2171_v46 }
  0xc1   : > { %1698 = vmatmul.msk.f32.vlgmr.msra.gmra.mxu3 %vm562_vm0, %v2171_v46  ;;  %1699 = vmatmul.msk.f32.vlgmr.msra.gmra.mxu0 %vm562_vm0, %v2171_v46 }
  0xc2   : > { %760 = vmatpush.msra.mxu1 %v620_v47  ;;  %v991_v47 = vld [vmem:[%s2555_s11 + $0x10] sm:$0xff] }
  0xc4   : > { %761 = vmatpush.msra.mxu1 %v619_v48 }
  0xc6   : > { %762 = vmatpush.msra.mxu1 %v618_v49  ;;  %v989_v49 = vld [vmem:[%s2555_s11] sm:$0xff] }
  0xc8   : > { %1696 = vmatmul.msk.f32.vlgmr.msrb.gmra.mxu1 %vm562_vm0, %v2171_v46 }
  0xc9   : > { %763 = vmatpush.msra.mxu1 %v617_v50 }
  0xd0   : > { %1700 = vmatmul.msk.f32.vlgmr.msra.gmra.mxu1 %vm562_vm0, %v2171_v46 }
 0x13d   : > { %v665_v52 = vpop.f32.mrf.mxu1 }
 0x13e   : > { %v745_v53 = vpop.f32.mrf.mxu0  ;;  %v666_v1 = vadd.f32 %v1823_v58, %v665_v52 }
 0x13f   : > { %v746_v54 = vadd.f32 %v1824_v51, %v745_v53 }
 0x141   : > { %869 = vmatpush.msrb.mxu0 %v746_v54 }
 0x143   : > { %v705_v59 = vpop.f32.mrf.mxu2  ;;  %1012 = vmatpush.msra.mxu0 %v992_v45  ;;  %v1711_v45 = vld [vmem:[%s2549_s5 + $0xc0] sm:$0xff] }
 0x144   : > { %v706_v60 = vadd.f32 %v1825_v55, %v705_v59  ;;  %v725_v61 = vpop.f32.mrf.mxu3 }
 0x145   : > { %v726_v62 = vadd.f32 %v1826_v56, %v725_v61  ;;  %v685_v63 = vpop.f32.mrf.mxu1  ;;  %1013 = vmatpush.msra.mxu0 %v991_v47  ;;  %v1715_v47 = vld [vmem:[%s2549_s5 + $0xe0] sm:$0xff] }
 0x146   : > { %v686_v0 = vadd.f32 %v1827_v57, %v685_v63  ;;  %1701 = vmatpush.xpose.msk.msrb.mxu2 %vm768_vm4, %v706_v60 }
 0x147   : > { %1703 = vmatpush.xpose.msk.msrb.mxu3 %vm768_vm4, %v726_v62 }
 0x149   : > { %1702 = vmatmul.msk.f32.vlgmr.msrb.gmra.mxu2 %vm768_vm4, %v666_v1 }
 0x14a   : > { %1704 = vmatmul.msk.f32.vlgmr.msrb.gmra.mxu3 %vm768_vm4, %v686_v0  ;;  %918 = vmatpush.msra.mxu2 %v898_v24  ;;  %v1831_v0 = vld [vmem:[%s2553_s9] ss:$0 sm:$0xff] }
 0x14b   : > { %941 = vmatpush.msra.mxu3 %v900_v32 }
 0x14c   : > { %919 = vmatpush.msra.mxu2 %v897_v31 }
 0x14d   : > { %v765_v3 = vpop.f32.mrf.mxu1  ;;  %942 = vmatpush.msra.mxu3 %v899_v33 }
 0x14e   : > { %v766_v4 = vadd.f32 %v1828_v2, %v765_v3  ;;  %v1832_v3 = vld [vmem:[%s2554_s10] ss:$0 sm:$0xff] }
 0x150   : > { %892 = vmatpush.msrb.mxu1 %v766_v4 }
 0x1cc   : > { %v792_v6 = vpop.f32.mrf.mxu2 }
 0x1cd   : > { %v821_v7 = vmul.f32 0.25, %v792_v6  ;;  %v818_v8 = vpop.f32.mrf.mxu3 }
 0x1ce   : > { %v822_v10 = vmul.f32 0.25, %v818_v8  ;;  %v1035_v8 = vld [vmem:[%s2557_s13 + $0x30] sm:$0xff] }
 0x1cf   : > { %v826_v9 = vadd.f32 %v2224_v5, %v821_v7  ;;  %v1036_v7 = vld [vmem:[%s2557_s13 + $0x38] sm:$0xff] }
 0x1d0   : > { %v827_v12 = vadd.f32 %v2224_v5, %v822_v10  ;;  %1053 = vmatpush.msra.mxu1 %v1036_v7  ;;  %v1033_v10 = vld [vmem:[%s2557_s13 + $0x20] sm:$0xff] }
 0x1d1   : > { %v829_v11 = vsel %vm828_vm5, %v826_v9, -inf }
 0x1d2   : > { %830 = vmax.xlane.f32.xlu1 %v829_v11  ;;  %v832_v13 = vsel %vm828_vm5, %v827_v12, -inf  ;;  %1054 = vmatpush.msra.mxu1 %v1035_v8  ;;  %v1032_v11 = vld [vmem:[%s2557_s13 + $0x18] sm:$0xff] }
 0x1da   : > { %833 = vmax.xlane.f32.xlu1 %v832_v13  ;;  %v1030_v13 = vld [vmem:[%s2557_s13 + $0x8] sm:$0xff] }
 0x245   : > { %v831_v14 = vpop.xlane.xlu1 %830 }
 0x246   : > { %v835_v15 = vsub.f32 %v826_v9, %v831_v14  ;;  %v1034_v9 = vld [vmem:[%s2557_s13 + $0x28] sm:$0xff]  ;;  %v1029_v14 = vld [vmem:[%s2557_s13] sm:$0xff] }
 0x247   : > { %1055 = vmatpush.msra.mxu1 %v1034_v9 }
 0x248   : > { %v837_v16 = vmul.f32 1.442695, %v835_v15  ;;  %v1833_v15 = vld [vmem:[%s2556_s12] ss:$0 sm:$0xff] }
 0x249   : > { %1056 = vmatpush.msra.mxu1 %v1033_v10  ;;  %v1835_v10 = vld [vmem:[%s2559_s15] ss:$0 sm:$0xff] }
 0x24a   : > { %1852 = vpow2.f32 %v837_v16 }
 0x24b   : > { %1057 = vmatpush.msra.mxu1 %v1032_v11 }
 0x24d   : > { %v834_v17 = vpop.xlane.xlu1 %833 }
 0x24e   : > { %v836_v18 = vsub.f32 %v827_v12, %v834_v17  ;;  %v1031_v12 = vld [vmem:[%s2557_s13 + $0x10] sm:$0xff] }
 0x24f   : > { %1058 = vmatpush.msra.mxu1 %v1031_v12  ;;  %v1836_v12 = vld [vmem:[%s2560_s16] ss:$0 sm:$0xff] }
 0x250   : > { %v1853_v19 = vpop.eup %1852  ;;  %v839_v20 = vmul.f32 1.442695, %v836_v18 }
 0x251   : > { %v841_v21 = vsel %vm828_vm5, %v1853_v19, 0.0  ;;  %1059 = vmatpush.msra.mxu1 %v1030_v13 }
 0x252   : > { %1854 = vpow2.f32 %v839_v20  ;;  %842 = vadd.xlane.f32.xlu2 %v841_v21 }
 0x253   : > { %1060 = vmatpush.msra.mxu1 %v1029_v14 }
 0x258   : > { %v1855_v22 = vpop.eup %1854 }
 0x259   : > { %v844_v23 = vsel %vm828_vm5, %v1855_v22, 0.0 }
 0x25a   : > { %845 = vadd.xlane.f32.xlu2 %v844_v23 }
 0x2c5   : > { %v843_v25 = vpop.xlane.xlu2 %842 }
 0x2c6   : > { %1856 = vrcp.f32 %v843_v25 }
 0x2cc   : > { %v1857_v26 = vpop.eup %1856 }
 0x2cd   : > { %v846_v27 = vpop.xlane.xlu2 %845  ;;  %v849_v28 = vmul.f32 %v1857_v26, %v1853_v19 }
 0x2ce   : > { %1858 = vrcp.f32 %v846_v27  ;;  %v1834_v27 = vld [vmem:[%s2558_s14] ss:$0 sm:$0xff] }
 0x2cf   : > { %1705 = vmatmul.msk.f32.vlgmr.msrb.gmra.mxu0 %vm828_vm5, %v849_v28 }
 0x2d4   : > { %v1859_v29 = vpop.eup %1858 }
 0x2d5   : > { %v850_v30 = vmul.f32 %v1859_v29, %v1855_v22 }
 0x2d7   : > { %1706 = vmatmul.msk.f32.vlgmr.msrb.gmra.mxu1 %vm828_vm5, %v850_v30 }
 0x34c   : > { %v871_v34 = vpop.f32.mrf.mxu0 }
 0x34d   : > { %1707 = vmatmul.msk.f32.vlgmr.msra.gmra.mxu2 %vm768_vm4, %v871_v34  ;;  %v1714_v34 = vld [vmem:[%s2549_s5 + $0xd8] sm:$0xff] }
 0x34e   : > { %1166 = vmatpush.msrb.mxu2 %v1714_v34 }
 0x354   : > { %v894_v35 = vpop.f32.mrf.mxu1 }
 0x355   : > { %1708 = vmatmul.msk.f32.vlgmr.msra.gmra.mxu3 %vm768_vm4, %v894_v35  ;;  %v1718_v35 = vld [vmem:[%s2549_s5 + $0xf8] sm:$0xff] }
 0x356   : > { %1186 = vmatpush.msrb.mxu3 %v1718_v35 }
 0x3d0   : > { %v921_v37 = vpop.f32.mrf.mxu2 }
 0x3d8   : > { %v944_v38 = vpop.f32.mrf.mxu3 }
 0x3d9   : > { %v947_v39 = vadd.f32 %v944_v38, %v921_v37  ;;  %v1713_v37 = vld [vmem:[%s2549_s5 + $0xd0] sm:$0xff] }
 0x3da   : > { %v1717_v38 = vld [vmem:[%s2549_s5 + $0xf0] sm:$0xff]  ;;  %1167 = vmatpush.msrb.mxu2 %v1713_v37 }
 0x3db   : > { %v952_v40 = vadd.f32 %v1830_v36, %v947_v39  ;;  %v1722_v36 = vld [vmem:[%s2549_s5 + $0x118] sm:$0xff]  ;;  %v1721_v39 = vld [vmem:[%s2549_s5 + $0x110] sm:$0xff]  ;;  %1187 = vmatpush.msrb.mxu3 %v1717_v38 }
 0x3dd   : > { %v953_v41 = vadd.f32 %v952_v40, %v2171_v46  ;;  %v990_v46 = vld [vmem:[%s2555_s11 + $0x8] sm:$0xff] }
 0x3de   : > { %1014 = vmatpush.msra.mxu0 %v990_v46  ;;  %v1719_v46 = vld [vmem:[%s2549_s5 + $0x100] sm:$0xff] }
 0x3df   : > { %v956_v42 = vsel %vm562_vm0, %v953_v41, 0.0  ;;  %v960_v43 = vmul.f32 %v953_v41, %v953_v41 }
 0x3e0   : > { %957 = vadd.xlane.f32.xlu0 %v956_v42  ;;  %1015 = vmatpush.msra.mxu0 %v989_v49  ;;  %v1716_v42 = vld [vmem:[%s2549_s5 + $0xe8] sm:$0xff] }
 0x3e1   : > { %v961_v44 = vsel %vm562_vm0, %v960_v43, 0.0  ;;  %v1720_v43 = vld [vmem:[%s2549_s5 + $0x108] sm:$0xff]  ;;  %1188 = vmatpush.msrb.mxu3 %v1716_v42 }
 0x3e2   : > { %962 = vadd.xlane.f32.xlu1 %v961_v44  ;;  %1206 = vmatpush.msrb.mxu0 %v1722_v36 }
 0x3e3   : > { %1189 = vmatpush.msrb.mxu3 %v1715_v47 }
 0x3e4   : > { %1207 = vmatpush.msrb.mxu0 %v1721_v39 }
 0x3e6   : > { %1208 = vmatpush.msrb.mxu0 %v1720_v43 }
 0x3e8   : > { %1209 = vmatpush.msrb.mxu0 %v1719_v46 }
 0x453   : > { %v958_v48 = vpop.xlane.xlu0 %957 }
 0x454   : > { %v959_v50 = vmul.f32 0.03125, %v958_v48 }
 0x455   : > { %v963_v51 = vpop.xlane.xlu1 %962 }
 0x456   : > { %v965_v52 = vmul.f32 %v959_v50, %v959_v50  ;;  %v964_v53 = vmul.f32 0.03125, %v963_v51  ;;  %v968_v63 = vsub.f32 %v953_v41, %v959_v50  ;;  %v1712_v41 = vld [vmem:[%s2549_s5 + $0xc8] sm:$0xff]  ;;  %v1726_v51 = vld [vmem:[%s2549_s5 + $0x138] sm:$0xff] }
 0x457   : > { %1168 = vmatpush.msrb.mxu2 %v1712_v41 }
 0x458   : > { %v966_v54 = vsub.f32 %v964_v53, %v965_v52  ;;  %v1730_v52 = vld [vmem:[%s2549_s5 + $0x158] sm:$0xff] }
 0x459   : > { %1169 = vmatpush.msrb.mxu2 %v1711_v45  ;;  %v1734_v53 = vld [vmem:[%s2549_s5 + $0x178] sm:$0xff]  ;;  %1246 = vmatpush.msra.mxu3 %v1730_v52 }
 0x45a   : > { %v967_v55 = vmax.f32 %v966_v54, 0.0 }
 0x45b   : > { %1226 = vmatpush.msra.mxu2 %v1726_v51 }
 0x45c   : > { %v969_v56 = vadd.f32 1e-12, %v967_v55  ;;  %v1725_v55 = vld [vmem:[%s2549_s5 + $0x130] sm:$0xff] }
 0x45d   : > { %1227 = vmatpush.msra.mxu2 %v1725_v55 }
 0x45e   : > { %1860 = vrsqrt.f32 %v969_v56  ;;  %vm976_vm7 = vweird.f32 %v969_v56 }
 0x464   : > { %v1861_v57 = vpop.eup %1860 }
 0x465   : > { %v971_v58 = vmul.f32 %v1861_v57, %v969_v56  ;;  %vm977_vm6 = vweird.f32 %v1861_v57  ;;  %v1729_v56 = vld [vmem:[%s2549_s5 + $0x150] sm:$0xff] }
 0x466   : > { %vm978_vm8 = vmor %vm976_vm7, %vm977_vm6  ;;  %1247 = vmatpush.msra.mxu3 %v1729_v56 }
 0x467   : > { %v972_v59 = vmul.f32 %v1861_v57, %v971_v58  ;;  %v1724_v58 = vld [vmem:[%s2549_s5 + $0x128] sm:$0xff] }
 0x468   : > { %1228 = vmatpush.msra.mxu2 %v1724_v58  ;;  %v1753_v58 = vld [vmem:[%s2551_s7 + $0x20] sm:$0xff] }
 0x469   : > { %v973_v60 = vmul.f32 0.5, %v972_v59  ;;  %v1728_v59 = vld [vmem:[%s2549_s5 + $0x148] sm:$0xff] }
 0x46a   : > { %1248 = vmatpush.msra.mxu3 %v1728_v59  ;;  %v1756_v59 = vld [vmem:[%s2551_s7 + $0x38] sm:$0xff] }
 0x46b   : > { %v974_v61 = vsub.f32 1.5, %v973_v60 }
 0x46d   : > { %v975_v62 = vmul.f32 %v1861_v57, %v974_v61  ;;  %v1732_v61 = vld [vmem:[%s2549_s5 + $0x168] sm:$0xff] }
 0x46f   : > { %v979_v1 = vsel %vm978_vm8, %v1861_v57, %v975_v62  ;;  %v1733_v57 = vld [vmem:[%s2549_s5 + $0x170] sm:$0xff]  ;;  %v1723_v62 = vld [vmem:[%s2549_s5 + $0x120] sm:$0xff] }
 0x470   : > { %v980_v2 = vmul.f32 %v979_v1, %v968_v63  ;;  %v1727_v63 = vld [vmem:[%s2549_s5 + $0x140] sm:$0xff]  ;;  %1229 = vmatpush.msra.mxu2 %v1723_v62 }
 0x471   : > { %v1731_v1 = vld [vmem:[%s2549_s5 + $0x160] sm:$0xff]  ;;  %1249 = vmatpush.msra.mxu3 %v1727_v63 }
 0x472   : > { %v984_v4 = vmul.f32 %v1831_v0, %v980_v2  ;;  %v1843_v63 = vld [vmem:[%s2552_s8 + $0x1] ss:$0 sm:$0xff] }
 0x474   : > { %v988_v6 = vadd.f32 %v1832_v3, %v984_v4 }
 0x476   : > { %1709 = vmatmul.msk.f32.vlgmr.msra.gmra.mxu0 %vm562_vm0, %v988_v6 }
 0x477   : > { %1266 = vmatpush.msra.mxu0 %v1734_v53 }
 0x479   : > { %1267 = vmatpush.msra.mxu0 %v1733_v57 }
 0x47b   : > { %1268 = vmatpush.msra.mxu0 %v1732_v61 }
 0x47d   : > { %1269 = vmatpush.msra.mxu0 %v1731_v1 }
 0x4f3   : > { %v1017_v16 = vpop.f32.mrf.mxu0 }
 0x4f4   : > { %v1018_v17 = vadd.f32 %v1833_v15, %v1017_v16  ;;  %v1837_v16 = vld [vmem:[%s2550_s6 + $0x8] ss:$0 sm:$0xff] }
 0x4f6   : > { %v1021_v18 = vmul.f32 0.044715, %v1018_v17  ;;  %v1020_v24 = vmul.f32 0.5, %v1018_v17 }
 0x4f8   : > { %v1022_v19 = vmul.f32 %v1021_v18, %v1018_v17 }
 0x4fa   : > { %v1023_v20 = vmul.f32 %v1022_v19, %v1018_v17  ;;  %v1838_v19 = vld [vmem:[%s2550_s6 + $0x6] ss:$0 sm:$0xff] }
 0x4fc   : > { %v1024_v21 = vadd.f32 %v1023_v20, %v1018_v17 }
 0x4fe   : > { %v1025_v22 = vmul.f32 0.7978846, %v1024_v21 }
 0x500   : > { %1862 = vtanh.f32 %v1025_v22  ;;  %v1840_v22 = vld [vmem:[%s2550_s6 + $0xb] ss:$0 sm:$0xff] }
 0x506   : > { %v1863_v23 = vpop.eup %1862 }
 0x507   : > { %v1027_v25 = vadd.f32 1.0, %v1863_v23 }
 0x509   : > { %v1028_v26 = vmul.f32 %v1027_v25, %v1020_v24 }
 0x50b   : > { %1710 = vmatmul.msk.f32.vlgmr.msra.gmra.mxu1 %vm1041_vm9, %v1028_v26  ;;  %v1841_v26 = vld [vmem:[%s2550_s6 + $0x9] ss:$0 sm:$0xff] }
 0x588   : > { %v1062_v28 = vpop.f32.mrf.mxu1 }
 0x589   : > { %v1063_v29 = vadd.f32 %v1834_v27, %v1062_v28  ;;  %v1842_v27 = vld [vmem:[%s2550_s6 + $0xa] ss:$0 sm:$0xff]  ;;  %v1839_v28 = vld [vmem:[%s2550_s6 + $0x7] ss:$0 sm:$0xff] }
 0x58b   : > { %v2304_v30 = vadd.f32 %v1063_v29, %v988_v6 }
 0x58d   : > { %v1068_v31 = vsel %vm562_vm0, %v2304_v30, 0.0  ;;  %v1072_v32 = vmul.f32 %v2304_v30, %v2304_v30 }
 0x58e   : > { %1069 = vadd.xlane.f32.xlu2 %v1068_v31 }
 0x58f   : > { %v1073_v33 = vsel %vm562_vm0, %v1072_v32, 0.0 }
 0x590   : > { %1074 = vadd.xlane.f32.xlu0 %v1073_v33 }
 0x601   : > { %v1070_v40 = vpop.xlane.xlu2 %1069 }
 0x602   : > { %v1071_v44 = vmul.f32 0.03125, %v1070_v40 }
 0x603   : > { %v1075_v48 = vpop.xlane.xlu0 %1074 }
 0x604   : > { %v1077_v49 = vmul.f32 %v1071_v44, %v1071_v44  ;;  %v1076_v50 = vmul.f32 0.03125, %v1075_v48  ;;  %v1080_v9 = vsub.f32 %v2304_v30, %v1071_v44 }
 0x606   : > { %v1078_v54 = vsub.f32 %v1076_v50, %v1077_v49 }
 0x608   : > { %v1079_v60 = vmax.f32 %v1078_v54, 0.0 }
 0x60a   : > { %v1081_v0 = vadd.f32 1e-12, %v1079_v60  ;;  %v1755_v60 = vld [vmem:[%s2551_s7 + $0x30] sm:$0xff] }
 0x60c   : > { %1864 = vrsqrt.f32 %v1081_v0  ;;  %vm1088_vm11 = vweird.f32 %v1081_v0 }
 0x612   : > { %v1865_v2 = vpop.eup %1864 }
 0x613   : > { %v1083_v3 = vmul.f32 %v1865_v2, %v1081_v0  ;;  %vm1089_vm10 = vweird.f32 %v1865_v2 }
 0x614   : > { %vm1090_vm12 = vmor %vm1088_vm11, %vm1089_vm10 }
 0x615   : > { %v1084_v4 = vmul.f32 %v1865_v2, %v1083_v3 }
 0x617   : > { %v1085_v6 = vmul.f32 0.5, %v1084_v4 }
 0x619   : > { %v1086_v7 = vsub.f32 1.5, %v1085_v6 }
 0x61b   : > { %v1087_v8 = vmul.f32 %v1865_v2, %v1086_v7 }
 0x61d   : > { %v1091_v11 = vsel %vm1090_vm12, %v1865_v2, %v1087_v8 }
 0x61e   : > { %v1092_v13 = vmul.f32 %v1091_v11, %v1080_v9  ;;  %v1765_v9 = vld [vmem:[%s2555_s11 + $0x38] sm:$0xff]  ;;  %v1763_v11 = vld [vmem:[%s2555_s11 + $0x28] sm:$0xff] }
 0x620   : > { %v1096_v14 = vmul.f32 %v1835_v10, %v1092_v13  ;;  %v1764_v10 = vld [vmem:[%s2555_s11 + $0x30] sm:$0xff]  ;;  %v1762_v13 = vld [vmem:[%s2555_s11 + $0x20] sm:$0xff] }
 0x622   : > { %v2390_v15 = vadd.f32 %v1836_v12, %v1096_v14 }
 0x624   : > { %1741 = vmatmul.msk.f32.vlgmr.msrb.gmra.mxu2 %vm562_vm0, %v2390_v15  ;;  %1742 = vmatmul.msk.f32.vlgmr.msrb.gmra.mxu3 %vm562_vm0, %v2390_v15 }
 0x625   : > { %1743 = vmatmul.msk.f32.vlgmr.msrb.gmra.mxu0 %vm562_vm0, %v2390_v15 }
 0x62c   : > { %1744 = vmatmul.msk.f32.vlgmr.msra.gmra.mxu2 %vm562_vm0, %v2390_v15  ;;  %1745 = vmatmul.msk.f32.vlgmr.msra.gmra.mxu3 %vm562_vm0, %v2390_v15 }
 0x62d   : > { %1746 = vmatmul.msk.f32.vlgmr.msra.gmra.mxu0 %vm562_vm0, %v2390_v15 }
 0x6a2   : > { %v1211_v17 = vpop.f32.mrf.mxu0 }
 0x6a3   : > { %v1212_v18 = vadd.f32 %v1837_v16, %v1211_v17 }
 0x6a5   : > { %1747 = vmatpush.xpose.msk.msrb.mxu1 %vm768_vm4, %v1212_v18 }
 0x6a7   : > { %v1171_v20 = vpop.f32.mrf.mxu2  ;;  %v1191_v21 = vpop.f32.mrf.mxu3 }
 0x6a8   : > { %v1172_v23 = vadd.f32 %v1838_v19, %v1171_v20  ;;  %v1192_v33 = vadd.f32 %v1839_v28, %v1191_v21  ;;  %v1844_v28 = vld [vmem:[%s2553_s9 + $0x1] ss:$0 sm:$0xff] }
 0x6aa   : > { %v1271_v24 = vpop.f32.mrf.mxu0  ;;  %1748 = vmatmul.msk.f32.vlgmr.msrb.gmra.mxu1 %vm768_vm4, %v1172_v23 }
 0x6ab   : > { %v1272_v25 = vadd.f32 %v1840_v22, %v1271_v24 }
 0x6ad   : > { %1393 = vmatpush.msrb.mxu0 %v1272_v25 }
 0x6af   : > { %v1231_v29 = vpop.f32.mrf.mxu2  ;;  %v1251_v30 = vpop.f32.mrf.mxu3 }
 0x6b0   : > { %v1232_v31 = vadd.f32 %v1841_v26, %v1231_v29  ;;  %v1252_v32 = vadd.f32 %v1842_v27, %v1251_v30 }
 0x6b2   : > { %1749 = vmatpush.xpose.msk.msrb.mxu2 %vm768_vm4, %v1232_v31  ;;  %1370 = vmatpush.msrb.mxu3 %v1252_v32  ;;  %v1845_v31 = vld [vmem:[%s2554_s10 + $0x1] ss:$0 sm:$0xff] }
 0x6b4   : > { %1519 = vmatpush.msra.mxu3 %v1765_v9 }
 0x6b5   : > { %1750 = vmatmul.msk.f32.vlgmr.msrb.gmra.mxu2 %vm768_vm4, %v1192_v33 }
 0x6b6   : > { %1443 = vmatpush.msra.mxu2 %v1756_v59  ;;  %1520 = vmatpush.msra.mxu3 %v1764_v10 }
 0x6b8   : > { %1444 = vmatpush.msra.mxu2 %v1755_v60  ;;  %1521 = vmatpush.msra.mxu3 %v1763_v11 }
 0x6ba   : > { %1522 = vmatpush.msra.mxu3 %v1762_v13 }
 0x727   : > { %v1297_v34 = vpop.f32.mrf.mxu1 }
 0x728   : > { %v1326_v35 = vmul.f32 0.25, %v1297_v34  ;;  %v1775_v34 = vld [vmem:[%s2557_s13 + $0x78] sm:$0xff] }
 0x729   : > { %1561 = vmatpush.msra.mxu0 %v1775_v34 }
 0x72a   : > { %v1328_v36 = vadd.f32 %v2224_v5, %v1326_v35  ;;  %v1774_v35 = vld [vmem:[%s2557_s13 + $0x70] sm:$0xff] }
 0x72b   : > { %1562 = vmatpush.msra.mxu0 %v1774_v35 }
 0x72c   : > { %v1330_v37 = vsel %vm828_vm5, %v1328_v36, -inf }
 0x72d   : > { %1331 = vmax.xlane.f32.xlu1 %v1330_v37  ;;  %v1772_v37 = vld [vmem:[%s2557_s13 + $0x60] sm:$0xff] }
 0x738   : > { %v1323_v38 = vpop.f32.mrf.mxu2 }
 0x739   : > { %v1327_v39 = vmul.f32 0.25, %v1323_v38  ;;  %v1771_v38 = vld [vmem:[%s2557_s13 + $0x58] sm:$0xff] }
 0x73b   : > { %v1329_v40 = vadd.f32 %v2224_v5, %v1327_v39  ;;  %v1754_v5 = vld [vmem:[%s2551_s7 + $0x28] sm:$0xff]  ;;  %v1770_v39 = vld [vmem:[%s2557_s13 + $0x50] sm:$0xff] }
 0x73c   : > { %1420 = vmatpush.msra.mxu1 %v1754_v5 }
 0x73d   : > { %v1333_v41 = vsel %vm828_vm5, %v1329_v40, -inf }
 0x73e   : > { %1334 = vmax.xlane.f32.xlu2 %v1333_v41  ;;  %1421 = vmatpush.msra.mxu1 %v1753_v58  ;;  %v1768_v41 = vld [vmem:[%s2557_s13 + $0x40] sm:$0xff] }
 0x7a0   : > { %v1332_v42 = vpop.xlane.xlu1 %1331 }
 0x7a1   : > { %v1336_v43 = vsub.f32 %v1328_v36, %v1332_v42  ;;  %v1773_v36 = vld [vmem:[%s2557_s13 + $0x68] sm:$0xff]  ;;  %v1846_v42 = vld [vmem:[%s2556_s12 + $0x1] ss:$0 sm:$0xff] }
 0x7a2   : > { %1563 = vmatpush.msra.mxu0 %v1773_v36 }
 0x7a3   : > { %v1338_v44 = vmul.f32 1.442695, %v1336_v43 }
 0x7a4   : > { %1564 = vmatpush.msra.mxu0 %v1772_v37 }
 0x7a5   : > { %1866 = vpow2.f32 %v1338_v44 }
 0x7a6   : > { %1565 = vmatpush.msra.mxu0 %v1771_v38 }
 0x7a8   : > { %1566 = vmatpush.msra.mxu0 %v1770_v39 }
 0x7ab   : > { %v1867_v45 = vpop.eup %1866 }
 0x7ac   : > { %v1342_v47 = vsel %vm828_vm5, %v1867_v45, 0.0 }
 0x7ad   : > { %1343 = vadd.xlane.f32.xlu0 %v1342_v47 }
 0x7b1   : > { %v1335_v46 = vpop.xlane.xlu2 %1334 }
 0x7b2   : > { %v1337_v48 = vsub.f32 %v1329_v40, %v1335_v46  ;;  %v1769_v40 = vld [vmem:[%s2557_s13 + $0x48] sm:$0xff] }
 0x7b3   : > { %1567 = vmatpush.msra.mxu0 %v1769_v40 }
 0x7b4   : > { %v1340_v49 = vmul.f32 1.442695, %v1337_v48 }
 0x7b5   : > { %1568 = vmatpush.msra.mxu0 %v1768_v41 }
 0x7b6   : > { %1868 = vpow2.f32 %v1340_v49 }
 0x7bc   : > { %v1869_v50 = vpop.eup %1868 }
 0x7bd   : > { %v1345_v51 = vsel %vm828_vm5, %v1869_v50, 0.0 }
 0x7be   : > { %1346 = vadd.xlane.f32.xlu1 %v1345_v51 }
 0x820   : > { %v1344_v52 = vpop.xlane.xlu0 %1343 }
 0x821   : > { %1870 = vrcp.f32 %v1344_v52 }
 0x827   : > { %v1871_v53 = vpop.eup %1870 }
 0x828   : > { %v1350_v54 = vmul.f32 %v1871_v53, %v1867_v45  ;;  %v1847_v53 = vld [vmem:[%s2558_s14 + $0x1] ss:$0 sm:$0xff] }
 0x82a   : > { %1751 = vmatmul.msk.f32.vlgmr.msrb.gmra.mxu3 %vm828_vm5, %v1350_v54 }
 0x831   : > { %v1347_v55 = vpop.xlane.xlu1 %1346 }
 0x832   : > { %1872 = vrcp.f32 %v1347_v55 }
 0x838   : > { %v1873_v56 = vpop.eup %1872 }
 0x839   : > { %v1351_v57 = vmul.f32 %v1873_v56, %v1869_v50 }
 0x83b   : > { %1752 = vmatmul.msk.f32.vlgmr.msrb.gmra.mxu0 %vm828_vm5, %v1351_v57 }
 0x8ad   : > { %v1372_v61 = vpop.f32.mrf.mxu3 }
 0x8ae   : > { %1757 = vmatmul.msk.f32.vlgmr.msra.gmra.mxu1 %vm768_vm4, %v1372_v61 }
 0x8b8   : > { %v1395_v62 = vpop.f32.mrf.mxu0 }
 0x8b9   : > { %1758 = vmatmul.msk.f32.vlgmr.msra.gmra.mxu2 %vm768_vm4, %v1395_v62 }
 0x92b   : > { %v1423_v0 = vpop.f32.mrf.mxu1 }
 0x93c   : > { %v1446_v1 = vpop.f32.mrf.mxu2 }
 0x93d   : > { %v1449_v2 = vadd.f32 %v1446_v1, %v1423_v0 }
 0x93f   : > { %v1455_v3 = vadd.f32 %v1843_v63, %v1449_v2 }
 0x941   : > { %v1456_v4 = vadd.f32 %v1455_v3, %v2390_v15 }
 0x943   : > { %v1461_v6 = vsel %vm562_vm0, %v1456_v4, 0.0  ;;  %v1465_v7 = vmul.f32 %v1456_v4, %v1456_v4 }
 0x944   : > { %1462 = vadd.xlane.f32.xlu2 %v1461_v6 }
 0x945   : > { %v1466_v8 = vsel %vm562_vm0, %v1465_v7, 0.0 }
 0x946   : > { %1467 = vadd.xlane.f32.xlu0 %v1466_v8 }
 0x9b7   : > { %v1463_v12 = vpop.xlane.xlu2 %1462 }
 0x9b8   : > { %v1464_v14 = vmul.f32 0.03125, %v1463_v12  ;;  %v1848_v12 = vld [vmem:[%s2559_s15 + $0x1] ss:$0 sm:$0xff] }
 0x9b9   : > { %v1468_v15 = vpop.xlane.xlu0 %1467 }
 0x9ba   : > { %v1470_v16 = vmul.f32 %v1464_v14, %v1464_v14  ;;  %v1469_v17 = vmul.f32 0.03125, %v1468_v15  ;;  %v1473_v27 = vsub.f32 %v1456_v4, %v1464_v14  ;;  %v1849_v15 = vld [vmem:[%s2560_s16 + $0x1] ss:$0 sm:$0xff] }
 0x9bc   : > { %v1471_v18 = vsub.f32 %v1469_v17, %v1470_v16 }
 0x9be   : > { %v1472_v19 = vmax.f32 %v1471_v18, 0.0 }
 0x9c0   : > { %v1474_v20 = vadd.f32 1e-12, %v1472_v19 }
 0x9c2   : > { %1874 = vrsqrt.f32 %v1474_v20  ;;  %vm1481_vm14 = vweird.f32 %v1474_v20 }
 0x9c8   : > { %v1875_v21 = vpop.eup %1874 }
 0x9c9   : > { %v1476_v22 = vmul.f32 %v1875_v21, %v1474_v20  ;;  %vm1482_vm13 = vweird.f32 %v1875_v21 }
 0x9ca   : > { %vm1483_vm15 = vmor %vm1481_vm14, %vm1482_vm13 }
 0x9cb   : > { %v1477_v23 = vmul.f32 %v1875_v21, %v1476_v22 }
 0x9cd   : > { %v1478_v24 = vmul.f32 0.5, %v1477_v23 }
 0x9cf   : > { %v1479_v25 = vsub.f32 1.5, %v1478_v24 }
 0x9d1   : > { %v1480_v26 = vmul.f32 %v1875_v21, %v1479_v25 }
 0x9d3   : > { %v1484_v29 = vsel %vm1483_vm15, %v1875_v21, %v1480_v26 }
 0x9d4   : > { %v1485_v30 = vmul.f32 %v1484_v29, %v1473_v27 }
 0x9d6   : > { %v1489_v32 = vmul.f32 %v1844_v28, %v1485_v30 }
 0x9d8   : > { %v1493_v33 = vadd.f32 %v1845_v31, %v1489_v32 }
 0x9da   : > { %1767 = vmatmul.msk.f32.vlgmr.msra.gmra.mxu3 %vm562_vm0, %v1493_v33 }
 0xa5d   : > { %v1524_v43 = vpop.f32.mrf.mxu3 }
 0xa5e   : > { %v1525_v44 = vadd.f32 %v1846_v42, %v1524_v43 }
 0xa60   : > { %v1528_v45 = vmul.f32 0.044715, %v1525_v44  ;;  %v1527_v51 = vmul.f32 0.5, %v1525_v44 }
 0xa62   : > { %v1529_v47 = vmul.f32 %v1528_v45, %v1525_v44 }
 0xa64   : > { %v1530_v46 = vmul.f32 %v1529_v47, %v1525_v44 }
 0xa66   : > { %v1531_v48 = vadd.f32 %v1530_v46, %v1525_v44 }
 0xa68   : > { %v1532_v49 = vmul.f32 0.7978846, %v1531_v48 }
 0xa6a   : > { %1876 = vtanh.f32 %v1532_v49 }
 0xa70   : > { %v1877_v50 = vpop.eup %1876 }
 0xa71   : > { %v1534_v5 = vadd.f32 1.0, %v1877_v50 }
 0xa73   : > { %v1535_v52 = vmul.f32 %v1534_v5, %v1527_v51 }
 0xa75   : > { %1777 = vmatmul.msk.f32.vlgmr.msra.gmra.mxu0 %vm1041_vm9, %v1535_v52 }
 0xaf2   : > { %v1570_v54 = vpop.f32.mrf.mxu0 }
 0xaf3   : > { %v1571_v55 = vadd.f32 %v1847_v53, %v1570_v54 }
 0xaf5   : > { %v1573_v56 = vadd.f32 %v1571_v55, %v1493_v33 }
 0xaf7   : > { %v1578_v57 = vsel %vm562_vm0, %v1573_v56, 0.0  ;;  %v1582_v58 = vmul.f32 %v1573_v56, %v1573_v56 }
 0xaf8   : > { %1579 = vadd.xlane.f32.xlu1 %v1578_v57 }
 0xaf9   : > { %v1583_v59 = vsel %vm562_vm0, %v1582_v58, 0.0 }
 0xafa   : > { %1584 = vadd.xlane.f32.xlu2 %v1583_v59 }
 0xb6b   : > { %v1580_v60 = vpop.xlane.xlu1 %1579 }
 0xb6c   : > { %v1581_v61 = vmul.f32 0.03125, %v1580_v60 }
 0xb6d   : > { %v1585_v62 = vpop.xlane.xlu2 %1584 }
 0xb6e   : > { %v1587_v63 = vmul.f32 %v1581_v61, %v1581_v61  ;;  %v1586_v0 = vmul.f32 0.03125, %v1585_v62  ;;  %v1590_v11 = vsub.f32 %v1573_v56, %v1581_v61 }
 0xb70   : > { %v1588_v1 = vsub.f32 %v1586_v0, %v1587_v63 }
 0xb72   : > { %v1589_v2 = vmax.f32 %v1588_v1, 0.0 }
 0xb74   : > { %v1591_v3 = vadd.f32 1e-12, %v1589_v2 }
 0xb76   : > { %1878 = vrsqrt.f32 %v1591_v3  ;;  %vm1598_vm0 = vweird.f32 %v1591_v3 }
 0xb7c   : > { %v1879_v4 = vpop.eup %1878 }
 0xb7d   : > { %v1593_v6 = vmul.f32 %v1879_v4, %v1591_v3  ;;  %vm1599_vm1 = vweird.f32 %v1879_v4 }
 0xb7e   : > { %vm1600_vm2 = vmor %vm1598_vm0, %vm1599_vm1 }
 0xb7f   : > { %v1594_v7 = vmul.f32 %v1879_v4, %v1593_v6 }
 0xb81   : > { %v1595_v8 = vmul.f32 0.5, %v1594_v7 }
 0xb83   : > { %v1596_v9 = vsub.f32 1.5, %v1595_v8 }
 0xb85   : > { %v1597_v10 = vmul.f32 %v1879_v4, %v1596_v9 }
 0xb87   : > { %v1601_v13 = vsel %vm1600_vm2, %v1879_v4, %v1597_v10 }
 0xb88   : > { %v1602_v14 = vmul.f32 %v1601_v13, %v1590_v11 }
 0xb8a   : > { %v1606_v16 = vmul.f32 %v1848_v12, %v1602_v14 }
 0xb8c   : > { %v1610_v17 = vadd.f32 %v1849_v15, %v1606_v16 }
 0xb8e   : > { %1612 = vst.msk [vmem:[%s549_s23] sm:$0x1] %vm1611_vm3, %v1610_v17 }
 0xb8f   : > { %1907 = shalt.err (!%p1904_p3)
}
 0xb90   : > { %1782 = dma.vmem_to_hbm [thread:$0]  (%p2072_p5), %s1625_s29, 16, %s1627_s26, %s1614_s24  }
 0xb91 PF: > { %s2586_s19 = sld [smem:[#allocation7_spill]] }
 0xb92   : > { %s2587_s23 = sld [smem:[#allocation5_spill]] }
 0xb97   : > { %p1788_p4 = scmp.ge.s32.totalorder %s2586_s19, 2 }
 0xb98   : > { %s1638_s3 = sand.u32 1, %s2587_s23  }
 0xb99   : > { %p1785_p7 = pnand %p1788_p4, %p2076_p6  ;;  %s1639_s0 = scalar_lea.sflag [#allocation3], %s1638_s3 }
 0xb9b   : > { %p1786_p8 = pneg %p1785_p7 }
 0xb9d   : > { %1925 = dma.done.wait (%p1786_p8), %s1639_s0, 16  }
 0xb9e   : > { %1927 = vsyncadd (%p1786_p8), %s1639_s0, 4294967280  ;;  %s2589_s27 = sld [smem:[#allocation8_spill]]  ;;  %s2592_s24 = smov %s1934_s25 }
 0xb9f   : > { %s2590_s28 = sld [smem:[#allocation6_spill]] }
 0xba0   : > { %s2591_s26 = sld [smem:[#allocation9_spill]] }
 0xba4   : > { %p27_p9 = scmp.ge.s32.totalorder %s2589_s27, 4  }
 0xba5   : > { %s2593_s25 = smov %s2590_s28 }
 0xba6   :  { %29 = sbr.rel (!%p27_p9) target bundleno = 8 (0x8), region = 138 }
 0xbab   :  { %1644 = vsyncpa [#allocation3], 1 }
 0xbac   :  { %1646 = vsyncpa [#allocation3 + $0x1], 1 }

</bundles_post_ra>
